<compile_context>
chip_gen: v6e
topology: v6e:2x2x1
jax: 0.10.0
libtpu: 0.0.40
codegen_flags: <defaults>
</compile_context>

<pallas_src>
import functools

import jax
import jax.numpy as jnp
from jax import lax
from jax.experimental import pallas as pl
from jax.experimental.pallas import tpu as pltpu


def _round_up(x, m):
    return (x + m - 1) // m * m


# --------------------------------- kernel ------------------------------------

def seq2seq_reinforce_kernel(
        xoh_ref, len_ref,
        enc_tab_ref, enc_whh_ref, enc_b_ref,
        dec_w_ref, dec_b_ref,
        att_w_ref, att_b_ref,
        out_w_ref, out_b_ref,
        seq_ref, logp_ref,
        xg_scr, eo_scr,
        *, t_enc, t_dec, start_id):
    Bp = len_ref.shape[0]
    H = enc_whh_ref.shape[0]
    Vp_out = out_w_ref.shape[1]

    lengths = len_ref[...]                       # [Bp, 1] int32
    enc_b = enc_b_ref[...]                       # [1, 4H]
    dec_b = dec_b_ref[...]                       # [1, 4H]
    att_b = att_b_ref[...]                       # [1, H]
    out_b = out_b_ref[...]                       # [1, Vp_out]  (padded cols = -1e30)

    def lstm_cell(pre, c):
        # PyTorch gate order i, f, g, o.  H is a multiple of 128 in the demo so
        # these slices are lane-aligned static views.
        i = jax.nn.sigmoid(pre[:, 0 * H:1 * H])
        f = jax.nn.sigmoid(pre[:, 1 * H:2 * H])
        g = jnp.tanh(pre[:, 2 * H:3 * H])
        o = jax.nn.sigmoid(pre[:, 3 * H:4 * H])
        c_new = f * c + i * g
        h_new = o * jnp.tanh(c_new)
        return h_new, c_new

    # ---- all encoder input-gate projections in ONE MXU pass (embedding already
    #      folded into enc_tab = emb @ W_ih), off the serial recurrence path.
    xg_scr[...] = jnp.dot(xoh_ref[...], enc_tab_ref[...],
                          preferred_element_type=jnp.float32)

    # ------------------------- encoder recurrence -----------------------------
    def enc_step(t, carry):
        h, c = carry
        r = pl.multiple_of(t * Bp, 8)
        pre = (xg_scr[pl.ds(r, Bp), :]
               + jnp.dot(h, enc_whh_ref[...], preferred_element_type=jnp.float32)
               + enc_b)
        h_new, c_new = lstm_cell(pre, c)
        valid = t < lengths                            # [Bp, 1] bool
        eo_scr[t] = jnp.where(valid, h_new, 0.0)       # pad_packed-style zero padding
        h = jnp.where(valid, h_new, h)                 # freeze state at last valid step
        c = jnp.where(valid, c_new, c)
        return h, c

    zeros_bh = jnp.zeros((Bp, H), jnp.float32)
    h_enc, c_enc = lax.fori_loop(0, t_enc, enc_step, (zeros_bh, zeros_bh))

    # --------------------- decoder (greedy / argmax path) ---------------------
    oh_iota = lax.broadcasted_iota(jnp.int32, (Bp, Vp_out), 1)   # one-hot + argmax
    out_lane = lax.broadcasted_iota(jnp.int32, (Bp, t_dec), 1)

    # attention is taken over the first max(lengths) encoder positions, matching
    # pad_packed_sequence's output length (no per-sequence masking, like the ref).
    l_max = jnp.max(lengths, axis=0, keepdims=True)              # [1, 1]
    t_pos = lax.broadcasted_iota(jnp.int32, (t_enc, Bp, 1), 0)   # [T_enc, Bp, 1]
    att_bias = jnp.where(t_pos < l_max[None, :, :], 0.0, -1e30)  # [T_enc, Bp, 1]

    def dec_step(t, carry):
        hd, cd, tok, seq_acc, logp_acc = carry

        # one fused MXU pass: [onehot(tok) | h] @ [emb @ W_ih ; W_hh]
        onehot = (oh_iota == tok).astype(jnp.float32)            # [Bp, Vp_out]
        pre = (jnp.dot(jnp.concatenate([onehot, hd], axis=-1), dec_w_ref[...],
                       preferred_element_type=jnp.float32)
               + dec_b)
        hd, cd = lstm_cell(pre, cd)

        # Luong attention over stacked encoder outputs.
        E = eo_scr[...]                                               # [T_enc, Bp, H]
        scores = jnp.sum(E * hd[None, :, :], axis=-1, keepdims=True)  # [T_enc, Bp, 1]
        scores = scores + att_bias
        m_att = jnp.max(scores, axis=0, keepdims=True)
        sexp = jnp.exp(scores - m_att)
        attn = sexp * pl.reciprocal(jnp.sum(sexp, axis=0, keepdims=True), approx=True)
        ctx = jnp.sum(E * attn, axis=0)                               # [Bp, H]

        comb = jnp.tanh(
            jnp.dot(jnp.concatenate([ctx, hd], axis=-1), att_w_ref[...],
                    preferred_element_type=jnp.float32) + att_b)
        logits = (jnp.dot(comb, out_w_ref[...], preferred_element_type=jnp.float32)
                  + out_b)                                            # [Bp, Vp_out]

        # greedy argmax token; its log-prob is max - logsumexp = -log(sum exp(l - m)).
        m = jnp.max(logits, axis=-1, keepdims=True)
        sumexp = jnp.sum(jnp.exp(logits - m), axis=-1, keepdims=True)
        chosen_lp = -jnp.log(sumexp)                                  # [Bp, 1]
        tok = jnp.min(jnp.where(logits == m, oh_iota, Vp_out),
                      axis=-1, keepdims=True).astype(jnp.int32)       # first max index

        seq_acc = jnp.where(out_lane == t, tok, seq_acc)
        logp_acc = jnp.where(out_lane == t, chosen_lp, logp_acc)
        return hd, cd, tok, seq_acc, logp_acc

    tok0 = jnp.full((Bp, 1), start_id, jnp.int32)
    carry0 = (h_enc, c_enc, tok0,
              jnp.zeros((Bp, t_dec), jnp.int32),
              jnp.zeros((Bp, t_dec), jnp.float32))
    _, _, _, seq_acc, logp_acc = lax.fori_loop(0, t_dec, dec_step, carry0)

    # one dense store per output instead of t_dec masked column writes.
    seq_ref[...] = seq_acc
    logp_ref[...] = logp_acc

    # TODO(synk): stochastic (non-argmax) sampling path of reinforce_forward would
    # need pltpu.prng_* categorical draws; only the deterministic argmax path is here.


# --------------------------------- wrapper -----------------------------------

def make_params(key, v_in, v_out, d, h):
    ks = jax.random.split(key, 12)
    n = lambda k, s: (0.1 * jax.random.normal(k, s)).astype(jnp.float32)
    return (
        n(ks[0], (v_in, d)),                   # encoder embedding
        n(ks[1], (d, 4 * h)),                  # encoder LSTM W_ih
        n(ks[2], (h, 4 * h)),                  # encoder LSTM W_hh
        jnp.zeros((1, 4 * h), jnp.float32),    # encoder LSTM bias (= b_ih + b_hh)
        n(ks[3], (v_out, d)),                  # decoder embedding
        n(ks[4], (d, 4 * h)),                  # decoder LSTM W_ih
        n(ks[5], (h, 4 * h)),                  # decoder LSTM W_hh
        jnp.zeros((1, 4 * h), jnp.float32),    # decoder LSTM bias (= b_ih + b_hh)
        n(ks[6], (h, h)),                      # attention linear, context part
        n(ks[7], (h, h)),                      # attention linear, hidden part
        jnp.zeros((1, h), jnp.float32),        # attention bias
        n(ks[8], (h, v_out)),                  # output projection W
        jnp.zeros((1, v_out), jnp.float32),    # output projection bias
    )


def seq2seq_parser_forward(x, params, *, start_id, end_id, decoder_max_len):
    """Seq2seqParser.forward(x, argmax=True): sort by length, run
    seq2seq.reinforce_forward inside one Pallas kernel, restore order."""
    (enc_emb, enc_wih, enc_whh, enc_b,
     dec_emb, dec_wih, dec_whh, dec_b,
     att_wc, att_wh, att_b, out_w, out_b) = params

    B, T_enc = x.shape
    H = enc_whh.shape[0]
    V_in = enc_emb.shape[0]
    V_out = dec_emb.shape[0]
    Vp_in = _round_up(V_in, 128)        # lane-aligned one-hots / fused tables
    Vp_out = _round_up(V_out, 128)
    Bp = max(8, _round_up(B, 8))        # full sublane tile

    f32 = jnp.float32

    # ---- _sort_batch: length = first end_id position + 1 (1 if absent), sort desc.
    lengths = jnp.argmax((x == end_id), axis=1).astype(jnp.int32) + 1
    idx_sorted = jnp.argsort(-lengths)
    x_sorted = x[idx_sorted]
    len_sorted = lengths[idx_sorted]

    # ---- pad batch to a full sublane tile (padded rows dropped afterwards).
    x_p = jnp.pad(x_sorted, ((0, Bp - B), (0, 0)))
    len_p = jnp.pad(len_sorted, (0, Bp - B), constant_values=1)[:, None]

    # ---- one-time algebraic folding of the weights (outside the kernel).
    enc_tab = jnp.zeros((Vp_in, 4 * H), f32).at[:V_in].set(enc_emb @ enc_wih)
    dec_tab = jnp.zeros((Vp_out, 4 * H), f32).at[:V_out].set(dec_emb @ dec_wih)
    dec_fused = jnp.concatenate([dec_tab, dec_whh], axis=0)           # [Vp_out+H, 4H]
    att_w = jnp.concatenate([att_wc, att_wh], axis=0)                 # [2H, H]
    out_w_p = jnp.zeros((H, Vp_out), f32).at[:, :V_out].set(out_w)
    out_b_p = jnp.full((1, Vp_out), -1e30, f32).at[:, :V_out].set(out_b)  # pad cols never win

    # encoder token one-hots, time-major rows: row t*Bp + b  <->  x_p[b, t]
    xoh = jax.nn.one_hot(x_p.T.reshape(-1), Vp_in, dtype=f32)         # [T_enc*Bp, Vp_in]

    vmem = pl.BlockSpec(memory_space=pltpu.MemorySpace.VMEM)
    kernel = functools.partial(seq2seq_reinforce_kernel,
                               t_enc=T_enc, t_dec=decoder_max_len, start_id=start_id)
    seq_p, logp_p = pl.pallas_call(
        kernel,
        out_shape=(jax.ShapeDtypeStruct((Bp, decoder_max_len), jnp.int32),
                   jax.ShapeDtypeStruct((Bp, decoder_max_len), jnp.float32)),
        in_specs=[vmem] * 11,
        out_specs=(vmem, vmem),
        scratch_shapes=[pltpu.VMEM((T_enc * Bp, 4 * H), f32),   # encoder input gates
                        pltpu.VMEM((T_enc, Bp, H), f32)],       # stacked encoder outputs
    )(xoh, len_p, enc_tab, enc_whh, enc_b, dec_fused, dec_b,
      att_w, att_b, out_w_p, out_b_p)

    # ---- _restore_order: drop batch padding, invert the length sort.
    inv = jnp.argsort(idx_sorted)
    return seq_p[:B][inv], logp_p[:B][inv]


# ----------------------------------- main ------------------------------------

if __name__ == "__main__":
    B = 2            # batch
    T_ENC = 8        # encoder_max_len
    T_DEC = 8        # decoder_max_len
    V_IN = 32        # question vocab size
    V_OUT = 16       # program vocab size
    D = 32           # word_vec_dim (folded away inside the kernel)
    H = 128          # hidden_size (lane-aligned gate slices)
    START_ID = 1
    END_ID = 2

    key = jax.random.PRNGKey(0)
    kx, kp = jax.random.split(key)

    # question tokens in [3, V_IN), with an <END> token placed per example
    x = jax.random.randint(kx, (B, T_ENC), 3, V_IN).astype(jnp.int32)
    x = x.at[0, 5].set(END_ID).at[1, 3].set(END_ID)

    params = make_params(kp, V_IN, V_OUT, D, H)

    rl_seq, logprobs = seq2seq_parser_forward(
        x, params, start_id=START_ID, end_id=END_ID, decoder_max_len=T_DEC)
    jax.block_until_ready((rl_seq, logprobs))

    assert rl_seq.shape == (B, T_DEC) and rl_seq.dtype == jnp.int32
    assert logprobs.shape == (B, T_DEC) and logprobs.dtype == jnp.float32
    assert bool(jnp.all(logprobs <= 0.0))
    assert bool(jnp.all((rl_seq >= 0) & (rl_seq < V_OUT)))
    print("KERNEL_OK")
</pallas_src>

<mosaic_0001>
module attributes {stable_mosaic.version = 11 : i64} {
  func.func @seq2seq_reinforce_kernel(%arg0: memref<64x128xf32, #tpu.memory_space<vmem>>, %arg1: memref<8x1xi32, #tpu.memory_space<vmem>>, %arg2: memref<128x512xf32, #tpu.memory_space<vmem>>, %arg3: memref<128x512xf32, #tpu.memory_space<vmem>>, %arg4: memref<1x512xf32, #tpu.memory_space<vmem>>, %arg5: memref<256x512xf32, #tpu.memory_space<vmem>>, %arg6: memref<1x512xf32, #tpu.memory_space<vmem>>, %arg7: memref<256x128xf32, #tpu.memory_space<vmem>>, %arg8: memref<1x128xf32, #tpu.memory_space<vmem>>, %arg9: memref<128x128xf32, #tpu.memory_space<vmem>>, %arg10: memref<1x128xf32, #tpu.memory_space<vmem>>, %arg11: memref<8x8xi32, #tpu.memory_space<vmem>>, %arg12: memref<8x8xf32, #tpu.memory_space<vmem>>, %arg13: memref<64x512xf32, #tpu.memory_space<vmem>>, %arg14: memref<8x8x128xf32, #tpu.memory_space<vmem>>) attributes {dimension_semantics = [], scalar_prefetch = 0 : i64, scratch_operands = 2 : i64, tpu.core_type = #tpu.core_type<tc>} {
    %c0 = arith.constant 0 : index
    %c0_0 = arith.constant 0 : index
    %0 = vector.load %arg1[%c0, %c0_0] : memref<8x1xi32, #tpu.memory_space<vmem>>, vector<8x1xi32>
    %c0_1 = arith.constant 0 : index
    %c0_2 = arith.constant 0 : index
    %1 = vector.load %arg4[%c0_1, %c0_2] : memref<1x512xf32, #tpu.memory_space<vmem>>, vector<1x512xf32>
    %c0_3 = arith.constant 0 : index
    %c0_4 = arith.constant 0 : index
    %2 = vector.load %arg6[%c0_3, %c0_4] : memref<1x512xf32, #tpu.memory_space<vmem>>, vector<1x512xf32>
    %c0_5 = arith.constant 0 : index
    %c0_6 = arith.constant 0 : index
    %3 = vector.load %arg8[%c0_5, %c0_6] : memref<1x128xf32, #tpu.memory_space<vmem>>, vector<1x128xf32>
    %c0_7 = arith.constant 0 : index
    %c0_8 = arith.constant 0 : index
    %4 = vector.load %arg10[%c0_7, %c0_8] : memref<1x128xf32, #tpu.memory_space<vmem>>, vector<1x128xf32>
    %c0_9 = arith.constant 0 : index
    %c0_10 = arith.constant 0 : index
    %5 = vector.load %arg0[%c0_9, %c0_10] : memref<64x128xf32, #tpu.memory_space<vmem>>, vector<64x128xf32>
    %c0_11 = arith.constant 0 : index
    %c0_12 = arith.constant 0 : index
    %6 = vector.load %arg2[%c0_11, %c0_12] : memref<128x512xf32, #tpu.memory_space<vmem>>, vector<128x512xf32>
    %cst = arith.constant dense<0.000000e+00> : vector<64x512xf32>
    %7 = tpu.matmul %5, %6, %cst {dimension_numbers = #tpu.dot_dimension_numbers<[1], [0], [0], [1], [0, 0, 1, 1], [], []>} : vector<64x128xf32>, vector<128x512xf32>, vector<64x512xf32> -> vector<64x512xf32>
    %c0_13 = arith.constant 0 : index
    %c0_14 = arith.constant 0 : index
    %8 = vector.load %arg13[%c0_13, %c0_14] : memref<64x512xf32, #tpu.memory_space<vmem>>, vector<64x512xf32>
    tpu.vector_store %arg13[%c0_13, %c0_14], %7 {strides = array<i32>} : memref<64x512xf32, #tpu.memory_space<vmem>>, vector<64x512xf32>,
    %cst_15 = arith.constant 0.000000e+00 : f32
    %9 = vector.broadcast %cst_15 : f32 to vector<8x128xf32>
    %c0_i32 = arith.constant 0 : i32
    %c8_i32 = arith.constant 8 : i32
    %10 = arith.addi %c0_i32, %c8_i32 : i32
    %c1_i32 = arith.constant 1 : i32
    %11:2 = scf.for %arg15 = %c0_i32 to %10 step %c1_i32 iter_args(%arg16 = %9, %arg17 = %9) -> (vector<8x128xf32>, vector<8x128xf32>)  : i32 {
      %c8_i32_31 = arith.constant 8 : i32
      %30 = arith.muli %arg15, %c8_i32_31 : i32
      %31 = tpu.assume_multiple %30, 8 : i32
      %32 = arith.index_cast %31 : i32 to index
      %c0_32 = arith.constant 0 : index
      %33 = vector.load %arg13[%32, %c0_32] : memref<64x512xf32, #tpu.memory_space<vmem>>, vector<8x512xf32>
      %c0_33 = arith.constant 0 : index
      %c0_34 = arith.constant 0 : index
      %34 = vector.load %arg3[%c0_33, %c0_34] : memref<128x512xf32, #tpu.memory_space<vmem>>, vector<128x512xf32>
      %cst_35 = arith.constant dense<0.000000e+00> : vector<8x512xf32>
      %35 = tpu.matmul %arg16, %34, %cst_35 {dimension_numbers = #tpu.dot_dimension_numbers<[1], [0], [0], [1], [0, 0, 1, 1], [], []>} : vector<8x128xf32>, vector<128x512xf32>, vector<8x512xf32> -> vector<8x512xf32>
      %36 = arith.addf %33, %35 : vector<8x512xf32>
      %37 = vector.broadcast %1 : vector<1x512xf32> to vector<8x512xf32>
      %38 = arith.addf %36, %37 : vector<8x512xf32>
      %39 = vector.extract_strided_slice %38 {offsets = [0, 0], sizes = [8, 128], strides = [1, 1]} : vector<8x512xf32> to vector<8x128xf32>
      %40 = arith.negf %39 : vector<8x128xf32>
      %41 = math.exp %40 : vector<8x128xf32>
      %cst_36 = arith.constant 1.000000e+00 : f32
      %42 = vector.broadcast %cst_36 : f32 to vector<8x128xf32>
      %43 = arith.addf %42, %41 : vector<8x128xf32>
      %44 = arith.divf %42, %43 : vector<8x128xf32>
      %45 = vector.extract_strided_slice %38 {offsets = [0, 128], sizes = [8, 128], strides = [1, 1]} : vector<8x512xf32> to vector<8x128xf32>
      %46 = arith.negf %45 : vector<8x128xf32>
      %47 = math.exp %46 : vector<8x128xf32>
      %cst_37 = arith.constant 1.000000e+00 : f32
      %48 = vector.broadcast %cst_37 : f32 to vector<8x128xf32>
      %49 = arith.addf %48, %47 : vector<8x128xf32>
      %50 = arith.divf %48, %49 : vector<8x128xf32>
      %51 = vector.extract_strided_slice %38 {offsets = [0, 256], sizes = [8, 128], strides = [1, 1]} : vector<8x512xf32> to vector<8x128xf32>
      %52 = math.tanh %51 : vector<8x128xf32>
      %53 = vector.extract_strided_slice %38 {offsets = [0, 384], sizes = [8, 128], strides = [1, 1]} : vector<8x512xf32> to vector<8x128xf32>
      %54 = arith.negf %53 : vector<8x128xf32>
      %55 = math.exp %54 : vector<8x128xf32>
      %cst_38 = arith.constant 1.000000e+00 : f32
      %56 = vector.broadcast %cst_38 : f32 to vector<8x128xf32>
      %57 = arith.addf %56, %55 : vector<8x128xf32>
      %58 = arith.divf %56, %57 : vector<8x128xf32>
      %59 = arith.mulf %50, %arg17 : vector<8x128xf32>
      %60 = arith.mulf %44, %52 : vector<8x128xf32>
      %61 = arith.addf %59, %60 : vector<8x128xf32>
      %62 = math.tanh %61 : vector<8x128xf32>
      %63 = arith.mulf %58, %62 : vector<8x128xf32>
      %64 = vector.broadcast %arg15 : i32 to vector<8x1xi32>
      %65 = arith.cmpi slt, %64, %0 : vector<8x1xi32>
      %cst_39 = arith.constant 0.000000e+00 : f32
      %66 = vector.shape_cast %65 : vector<8x1xi1> to vector<8x1xi1>
      %67 = vector.broadcast %66 : vector<8x1xi1> to vector<8x128xi1>
      %68 = vector.broadcast %cst_39 : f32 to vector<8x128xf32>
      %69 = arith.select %67, %63, %68 : vector<8x128xi1>, vector<8x128xf32>
      %70 = arith.index_cast %arg15 : i32 to index
      %c0_40 = arith.constant 0 : index
      %c0_41 = arith.constant 0 : index
      %71 = vector.load %arg14[%70, %c0_40, %c0_41] : memref<8x8x128xf32, #tpu.memory_space<vmem>>, vector<1x8x128xf32>
      %72 = vector.shape_cast %71 : vector<1x8x128xf32> to vector<8x128xf32>
      %73 = vector.shape_cast %69 : vector<8x128xf32> to vector<1x8x128xf32>
      tpu.vector_store %arg14[%70, %c0_40, %c0_41], %73 {strides = array<i32>} : memref<8x8x128xf32, #tpu.memory_space<vmem>>, vector<1x8x128xf32>,
      %74 = vector.shape_cast %65 : vector<8x1xi1> to vector<8x1xi1>
      %75 = vector.broadcast %74 : vector<8x1xi1> to vector<8x128xi1>
      %76 = arith.select %75, %63, %arg16 : vector<8x128xi1>, vector<8x128xf32>
      %77 = vector.shape_cast %65 : vector<8x1xi1> to vector<8x1xi1>
      %78 = vector.broadcast %77 : vector<8x1xi1> to vector<8x128xi1>
      %79 = arith.select %78, %61, %arg17 : vector<8x128xi1>, vector<8x128xf32>
      scf.yield %76, %79 : vector<8x128xf32>, vector<8x128xf32>
    }
    %c8_i32_16 = arith.constant 8 : i32
    %12 = tpu.iota {dimensions = array<i32: 1>} : vector<8x128xi32>
    %13 = tpu.iota {dimensions = array<i32: 1>} : vector<8x8xi32>
    %cst_17 = arith.constant dense<-2147483648> : vector<1xi32>
    %14 = vector.multi_reduction <maxsi>, %0, %cst_17 [0] : vector<8x1xi32> to vector<1xi32>
    %15 = vector.shape_cast %14 : vector<1xi32> to vector<1x1xi32>
    %16 = tpu.iota {dimensions = array<i32: 0>} : vector<8x8x1xi32>
    %17 = vector.shape_cast %15 : vector<1x1xi32> to vector<1x1x1xi32>
    %18 = vector.broadcast %17 : vector<1x1x1xi32> to vector<8x8x1xi32>
    %19 = arith.cmpi slt, %16, %18 : vector<8x8x1xi32>
    %cst_18 = arith.constant 0.000000e+00 : f32
    %cst_19 = arith.constant -1.000000e+30 : f32
    %20 = vector.broadcast %cst_18 : f32 to vector<8x8x1xf32>
    %21 = vector.broadcast %cst_19 : f32 to vector<8x8x1xf32>
    %22 = arith.select %19, %20, %21 : vector<8x8x1xi1>, vector<8x8x1xf32>
    %c1_i32_20 = arith.constant 1 : i32
    %23 = vector.broadcast %c1_i32_20 : i32 to vector<8x1xi32>
    %c0_i32_21 = arith.constant 0 : i32
    %24 = vector.broadcast %c0_i32_21 : i32 to vector<8x8xi32>
    %cst_22 = arith.constant 0.000000e+00 : f32
    %25 = vector.broadcast %cst_22 : f32 to vector<8x8xf32>
    %c0_i32_23 = arith.constant 0 : i32
    %c8_i32_24 = arith.constant 8 : i32
    %26 = arith.addi %c0_i32_23, %c8_i32_24 : i32
    %c1_i32_25 = arith.constant 1 : i32
    %27:5 = scf.for %arg15 = %c0_i32_23 to %26 step %c1_i32_25 iter_args(%arg16 = %11#0, %arg17 = %11#1, %arg18 = %23, %arg19 = %24, %arg20 = %25) -> (vector<8x128xf32>, vector<8x128xf32>, vector<8x1xi32>, vector<8x8xi32>, vector<8x8xf32>)  : i32 {
      %30 = vector.broadcast %arg18 : vector<8x1xi32> to vector<8x128xi32>
      %31 = arith.cmpi eq, %12, %30 : vector<8x128xi32>
      %32 = arith.extui %31 : vector<8x128xi1> to vector<8x128xi32>
      %33 = arith.sitofp %32 : vector<8x128xi32> to vector<8x128xf32>
      %34 = tpu.concatenate %33, %arg16 in 1 : vector<8x128xf32>, vector<8x128xf32> -> vector<8x256xf32>
      %c0_31 = arith.constant 0 : index
      %c0_32 = arith.constant 0 : index
      %35 = vector.load %arg5[%c0_31, %c0_32] : memref<256x512xf32, #tpu.memory_space<vmem>>, vector<256x512xf32>
      %cst_33 = arith.constant dense<0.000000e+00> : vector<8x512xf32>
      %36 = tpu.matmul %34, %35, %cst_33 {dimension_numbers = #tpu.dot_dimension_numbers<[1], [0], [0], [1], [0, 0, 1, 1], [], []>} : vector<8x256xf32>, vector<256x512xf32>, vector<8x512xf32> -> vector<8x512xf32>
      %37 = vector.broadcast %2 : vector<1x512xf32> to vector<8x512xf32>
      %38 = arith.addf %36, %37 : vector<8x512xf32>
      %39 = vector.extract_strided_slice %38 {offsets = [0, 0], sizes = [8, 128], strides = [1, 1]} : vector<8x512xf32> to vector<8x128xf32>
      %40 = arith.negf %39 : vector<8x128xf32>
      %41 = math.exp %40 : vector<8x128xf32>
      %cst_34 = arith.constant 1.000000e+00 : f32
      %42 = vector.broadcast %cst_34 : f32 to vector<8x128xf32>
      %43 = arith.addf %42, %41 : vector<8x128xf32>
      %44 = arith.divf %42, %43 : vector<8x128xf32>
      %45 = vector.extract_strided_slice %38 {offsets = [0, 128], sizes = [8, 128], strides = [1, 1]} : vector<8x512xf32> to vector<8x128xf32>
      %46 = arith.negf %45 : vector<8x128xf32>
      %47 = math.exp %46 : vector<8x128xf32>
      %cst_35 = arith.constant 1.000000e+00 : f32
      %48 = vector.broadcast %cst_35 : f32 to vector<8x128xf32>
      %49 = arith.addf %48, %47 : vector<8x128xf32>
      %50 = arith.divf %48, %49 : vector<8x128xf32>
      %51 = vector.extract_strided_slice %38 {offsets = [0, 256], sizes = [8, 128], strides = [1, 1]} : vector<8x512xf32> to vector<8x128xf32>
      %52 = math.tanh %51 : vector<8x128xf32>
      %53 = vector.extract_strided_slice %38 {offsets = [0, 384], sizes = [8, 128], strides = [1, 1]} : vector<8x512xf32> to vector<8x128xf32>
      %54 = arith.negf %53 : vector<8x128xf32>
      %55 = math.exp %54 : vector<8x128xf32>
      %cst_36 = arith.constant 1.000000e+00 : f32
      %56 = vector.broadcast %cst_36 : f32 to vector<8x128xf32>
      %57 = arith.addf %56, %55 : vector<8x128xf32>
      %58 = arith.divf %56, %57 : vector<8x128xf32>
      %59 = arith.mulf %50, %arg17 : vector<8x128xf32>
      %60 = arith.mulf %44, %52 : vector<8x128xf32>
      %61 = arith.addf %59, %60 : vector<8x128xf32>
      %62 = math.tanh %61 : vector<8x128xf32>
      %63 = arith.mulf %58, %62 : vector<8x128xf32>
      %c0_37 = arith.constant 0 : index
      %c0_38 = arith.constant 0 : index
      %c0_39 = arith.constant 0 : index
      %64 = vector.load %arg14[%c0_37, %c0_38, %c0_39] : memref<8x8x128xf32, #tpu.memory_space<vmem>>, vector<8x8x128xf32>
      %65 = vector.shape_cast %63 : vector<8x128xf32> to vector<1x8x128xf32>
      %66 = vector.broadcast %65 : vector<1x8x128xf32> to vector<8x8x128xf32>
      %67 = arith.mulf %64, %66 : vector<8x8x128xf32>
      %cst_40 = arith.constant dense<0.000000e+00> : vector<8x8xf32>
      %68 = vector.multi_reduction <add>, %67, %cst_40 [2] : vector<8x8x128xf32> to vector<8x8xf32>
      %69 = vector.shape_cast %68 : vector<8x8xf32> to vector<8x8x1xf32>
      %70 = arith.addf %69, %22 : vector<8x8x1xf32>
      %cst_41 = arith.constant dense<0xFF800000> : vector<8x1xf32>
      %71 = vector.multi_reduction <maximumf>, %70, %cst_41 [0] : vector<8x8x1xf32> to vector<8x1xf32>
      %72 = vector.shape_cast %71 : vector<8x1xf32> to vector<1x8x1xf32>
      %73 = vector.broadcast %72 : vector<1x8x1xf32> to vector<8x8x1xf32>
      %74 = arith.subf %70, %73 : vector<8x8x1xf32>
      %75 = math.exp %74 : vector<8x8x1xf32>
      %cst_42 = arith.constant dense<0.000000e+00> : vector<8x1xf32>
      %76 = vector.multi_reduction <add>, %75, %cst_42 [0] : vector<8x8x1xf32> to vector<8x1xf32>
      %77 = vector.shape_cast %76 : vector<8x1xf32> to vector<1x8x1xf32>
      %78 = tpu.reciprocal %77 {approx = true} : vector<1x8x1xf32> -> vector<1x8x1xf32>
      %79 = vector.broadcast %78 : vector<1x8x1xf32> to vector<8x8x1xf32>
      %80 = arith.mulf %75, %79 : vector<8x8x1xf32>
      %81 = vector.broadcast %80 : vector<8x8x1xf32> to vector<8x8x128xf32>
      %82 = arith.mulf %64, %81 : vector<8x8x128xf32>
      %cst_43 = arith.constant dense<0.000000e+00> : vector<8x128xf32>
      %83 = vector.multi_reduction <add>, %82, %cst_43 [0] : vector<8x8x128xf32> to vector<8x128xf32>
      %84 = tpu.concatenate %83, %63 in 1 : vector<8x128xf32>, vector<8x128xf32> -> vector<8x256xf32>
      %c0_44 = arith.constant 0 : index
      %c0_45 = arith.constant 0 : index
      %85 = vector.load %arg7[%c0_44, %c0_45] : memref<256x128xf32, #tpu.memory_space<vmem>>, vector<256x128xf32>
      %cst_46 = arith.constant dense<0.000000e+00> : vector<8x128xf32>
      %86 = tpu.matmul %84, %85, %cst_46 {dimension_numbers = #tpu.dot_dimension_numbers<[1], [0], [0], [1], [0, 0, 1, 1], [], []>} : vector<8x256xf32>, vector<256x128xf32>, vector<8x128xf32> -> vector<8x128xf32>
      %87 = vector.broadcast %3 : vector<1x128xf32> to vector<8x128xf32>
      %88 = arith.addf %86, %87 : vector<8x128xf32>
      %89 = math.tanh %88 : vector<8x128xf32>
      %c0_47 = arith.constant 0 : index
      %c0_48 = arith.constant 0 : index
      %90 = vector.load %arg9[%c0_47, %c0_48] : memref<128x128xf32, #tpu.memory_space<vmem>>, vector<128x128xf32>
      %cst_49 = arith.constant dense<0.000000e+00> : vector<8x128xf32>
      %91 = tpu.matmul %89, %90, %cst_49 {dimension_numbers = #tpu.dot_dimension_numbers<[1], [0], [0], [1], [0, 0, 1, 1], [], []>} : vector<8x128xf32>, vector<128x128xf32>, vector<8x128xf32> -> vector<8x128xf32>
      %92 = vector.broadcast %4 : vector<1x128xf32> to vector<8x128xf32>
      %93 = arith.addf %91, %92 : vector<8x128xf32>
      %cst_50 = arith.constant dense<0xFF800000> : vector<8xf32>
      %94 = vector.multi_reduction <maximumf>, %93, %cst_50 [1] : vector<8x128xf32> to vector<8xf32>
      %95 = vector.shape_cast %94 : vector<8xf32> to vector<8x1xf32>
      %96 = vector.broadcast %95 : vector<8x1xf32> to vector<8x128xf32>
      %97 = arith.subf %93, %96 : vector<8x128xf32>
      %98 = math.exp %97 : vector<8x128xf32>
      %cst_51 = arith.constant dense<0.000000e+00> : vector<8xf32>
      %99 = vector.multi_reduction <add>, %98, %cst_51 [1] : vector<8x128xf32> to vector<8xf32>
      %100 = vector.shape_cast %99 : vector<8xf32> to vector<8x1xf32>
      %101 = math.log %100 : vector<8x1xf32>
      %cst_52 = arith.constant 0.000000e+00 : f32
      %102 = vector.broadcast %cst_52 : f32 to vector<8x1xf32>
      %103 = arith.subf %102, %101 : vector<8x1xf32>
      %104 = vector.broadcast %95 : vector<8x1xf32> to vector<8x128xf32>
      %105 = arith.cmpf oeq, %93, %104 : vector<8x128xf32>
      %c128_i32 = arith.constant 128 : i32
      %106 = vector.broadcast %c128_i32 : i32 to vector<8x128xi32>
      %107 = arith.select %105, %12, %106 : vector<8x128xi1>, vector<8x128xi32>
      %cst_53 = arith.constant dense<2147483647> : vector<8xi32>
      %108 = vector.multi_reduction <minsi>, %107, %cst_53 [1] : vector<8x128xi32> to vector<8xi32>
      %109 = vector.shape_cast %108 : vector<8xi32> to vector<8x1xi32>
      %110 = vector.broadcast %arg15 : i32 to vector<8x8xi32>
      %111 = arith.cmpi eq, %13, %110 : vector<8x8xi32>
      %112 = vector.shape_cast %109 : vector<8x1xi32> to vector<8x1xi32>
      %113 = vector.broadcast %112 : vector<8x1xi32> to vector<8x8xi32>
      %114 = arith.select %111, %113, %arg19 : vector<8x8xi1>, vector<8x8xi32>
      %115 = vector.broadcast %arg15 : i32 to vector<8x8xi32>
      %116 = arith.cmpi eq, %13, %115 : vector<8x8xi32>
      %117 = vector.shape_cast %103 : vector<8x1xf32> to vector<8x1xf32>
      %118 = vector.broadcast %117 : vector<8x1xf32> to vector<8x8xf32>
      %119 = arith.select %116, %118, %arg20 : vector<8x8xi1>, vector<8x8xf32>
      scf.yield %63, %61, %109, %114, %119 : vector<8x128xf32>, vector<8x128xf32>, vector<8x1xi32>, vector<8x8xi32>, vector<8x8xf32>
    }
    %c8_i32_26 = arith.constant 8 : i32
    %c0_27 = arith.constant 0 : index
    %c0_28 = arith.constant 0 : index
    %28 = vector.load %arg11[%c0_27, %c0_28] : memref<8x8xi32, #tpu.memory_space<vmem>>, vector<8x8xi32>
    tpu.vector_store %arg11[%c0_27, %c0_28], %27#3 {strides = array<i32>} : memref<8x8xi32, #tpu.memory_space<vmem>>, vector<8x8xi32>,
    %c0_29 = arith.constant 0 : index
    %c0_30 = arith.constant 0 : index
    %29 = vector.load %arg12[%c0_29, %c0_30] : memref<8x8xf32, #tpu.memory_space<vmem>>, vector<8x8xf32>
    tpu.vector_store %arg12[%c0_29, %c0_30], %27#4 {strides = array<i32>} : memref<8x8xf32, #tpu.memory_space<vmem>>, vector<8x8xf32>,
    return
  }
}

</mosaic_0001>

<bundles_post_ra>
// kernel: tpu_custom_call.1
= control target key start
LH: loop header
LB: loop body
LE: loop exit
PB: predicated region body
PF: predicated region fallthrough
CT: control target
= control target key end

     0   :  { %18 = vsyncpa [#allocation5], 0  ;;  %s2480_s0 = inlined_call_operand.hbm [shape: f32[64,128], index: 0, kind: input, shape index: {}]   ;;  %s2481_s1 = inlined_call_operand.vmem [shape: s32[8,1], index: 1, kind: input, shape index: {}]   ;;  %s2482_s2 = inlined_call_operand.hbm [shape: f32[128,512], index: 2, kind: input, shape index: {}]   ;;  %s2483_s3 = inlined_call_operand.hbm [shape: f32[128,512], index: 3, kind: input, shape index: {}]   ;;  %s2484_s4 = inlined_call_operand.vmem [shape: f32[1,512], index: 4, kind: input, shape index: {}]   ;;  %s2485_s5 = inlined_call_operand.hbm [shape: f32[256,512], index: 5, kind: input, shape index: {}]   ;;  %s2486_s6 = inlined_call_operand.vmem [shape: f32[1,512], index: 6, kind: input, shape index: {}]   ;;  %s2487_s7 = inlined_call_operand.hbm [shape: f32[256,128], index: 7, kind: input, shape index: {}]   ;;  %s2488_s8 = inlined_call_operand.vmem [shape: f32[1,128], index: 8, kind: input, shape index: {}]   ;;  %s2489_s9 = inlined_call_operand.hbm [shape: f32[128,128], index: 9, kind: input, shape index: {}]   ;;  %s2490_s10 = inlined_call_operand.vmem [shape: f32[1,128], index: 10, kind: input, shape index: {}]   ;;  %s2491_s11 = inlined_call_operand.hbm [shape: s32[8,8], index: 11, kind: output, shape index: {0}]   ;;  %s2492_s12 = inlined_call_operand.hbm [shape: f32[8,8], index: 12, kind: output, shape index: {1}]  }
   0x1   :  { %19 = vsyncpa [#allocation8], 0 }
   0x2   :  { %20 = vsyncpa [#allocation11], 0 }
   0x3   :  { %21 = vsyncpa [#allocation14], 0 }
   0x4   :  { %22 = vsyncpa [#allocation6], 0 }
   0x5   :  { %23 = vsyncpa [#allocation17], 0  ;;  %s2062_s21 = smov [#allocation7]  }
   0x6   :  { %s43_s22 = sshll.u32 %s2062_s21, 4  ;;  %s44_s22 = int_to_ptr.vmem [resolvable:$true] %s43_s22 }
   0x7   :  { %s1826_s23 = scalar_lea.vmem %s44_s22, 8192  ;;  %p1831_p1 = scmp.lt.s32.totalorder %s44_s22, %s44_s22 }
   0x8   :  { %p1827_p0 = scmp.ne.s32.totalorder %s44_s22, %s1826_s23  ;;  %p1832_p2 = scmp.lt.s32.totalorder %s1826_s23, %s1826_s23 }
   0xa   :  { %p1833_p3 = por %p1832_p2, %p1831_p1 }
   0xc   :  { %p1834_p4 = pnand %p1833_p3, %p1827_p0 }
   0xe   :  { %1837 = shalt.err (!%p1834_p4)
}
   0xf   :  { %s2063_s24 = smov 512   ;;  %s2064_s25 = smov 32  }
  0x10   :  { %49 = dma.hbm_to_vmem [thread:$0]  %s2482_s2, 8192, %s44_s22, [#allocation8], %s2063_s24, %s2063_s24, %s2064_s25  }
  0x11   :  { %s2065_s28 = smov [#allocation10]   ;;  %s2066_s30 = smov [#allocation4]  }
  0x12   :  { %s69_s29 = sshll.u32 %s2065_s28, 4  ;;  %s29_s13 = sshll.u32 %s2066_s30, 4  ;;  %s70_s29 = int_to_ptr.vmem [resolvable:$true] %s69_s29  ;;  %s30_s13 = int_to_ptr.vmem [resolvable:$true] %s29_s13 }
  0x13   :  { %s1846_s14 = scalar_lea.vmem %s70_s29, 16384  ;;  %p1851_p6 = scmp.lt.s32.totalorder %s70_s29, %s70_s29 }
  0x14   :  { %p1847_p5 = scmp.ne.s32.totalorder %s70_s29, %s1846_s14  ;;  %p1852_p7 = scmp.lt.s32.totalorder %s1846_s14, %s1846_s14 }
  0x16   :  { %p1853_p8 = por %p1852_p7, %p1851_p6 }
  0x18   :  { %p1854_p9 = pnand %p1853_p8, %p1847_p5 }
  0x1a   :  { %1857 = shalt.err (!%p1854_p9)
}
  0x1b   :  { %75 = dma.hbm_to_vmem [thread:$0]  %s2485_s5, 16384, %s70_s29, [#allocation11], %s2063_s24, %s2063_s24, %s2064_s25  }
  0x1c   :  { %s1866_s2 = scalar_lea.vmem %s30_s13, 1024  ;;  %p1871_p11 = scmp.lt.s32.totalorder %s30_s13, %s30_s13 }
  0x1d   :  { %p1867_p10 = scmp.ne.s32.totalorder %s30_s13, %s1866_s2  ;;  %p1872_p12 = scmp.lt.s32.totalorder %s1866_s2, %s1866_s2 }
  0x1f   :  { %p1873_p13 = por %p1872_p12, %p1871_p11 }
  0x21   :  { %p1874_p0 = pnand %p1873_p13, %p1867_p10 }
  0x23   :  { %1877 = shalt.err (!%p1874_p0)
}
  0x24   :  { %s2067_s17 = smov 128   ;;  %s2068_s18 = smov 8  }
  0x25   :  { %35 = dma.hbm_to_vmem [thread:$0]  %s2480_s0, 1024, %s30_s13, [#allocation5], %s2067_s17, %s2067_s17, %s2068_s18  }
  0x26   :  { %s2069_s21 = smov [#allocation9]   ;;  %s2070_s5 = smov [#allocation12]  }
  0x27   :  { %s55_s22 = sshll.u32 %s2069_s21, 4  ;;  %s83_s23 = sshll.u32 %s2070_s5, 4  ;;  %s56_s22 = int_to_ptr.vmem [resolvable:$true] %s55_s22  ;;  %s84_s23 = int_to_ptr.vmem [resolvable:$true] %s83_s23 }
  0x28   :  { %s1886_s26 = scalar_lea.vmem %s56_s22, 8192  ;;  %p1891_p2 = scmp.lt.s32.totalorder %s56_s22, %s56_s22 }
  0x29   :  { %p1887_p1 = scmp.ne.s32.totalorder %s56_s22, %s1886_s26  ;;  %p1892_p3 = scmp.lt.s32.totalorder %s1886_s26, %s1886_s26 }
  0x2b   :  { %p1893_p4 = por %p1892_p3, %p1891_p2 }
  0x2d   :  { %p1894_p5 = pnand %p1893_p4, %p1887_p1 }
  0x2f   :  { %1897 = shalt.err (!%p1894_p5)
}
  0x30   :  { %61 = dma.hbm_to_vmem [thread:$0]  %s2483_s3, 8192, %s56_s22, [#allocation8], %s2063_s24, %s2063_s24, %s2064_s25  }
  0x31   :  { %s1906_s0 = scalar_lea.vmem %s84_s23, 4096  ;;  %p1911_p7 = scmp.lt.s32.totalorder %s84_s23, %s84_s23 }
  0x32   :  { %p1907_p6 = scmp.ne.s32.totalorder %s84_s23, %s1906_s0  ;;  %p1912_p8 = scmp.lt.s32.totalorder %s1906_s0, %s1906_s0 }
  0x34   :  { %p1913_p9 = por %p1912_p8, %p1911_p7 }
  0x36   :  { %p1914_p10 = pnand %p1913_p9, %p1907_p6 }
  0x38   :  { %1917 = shalt.err (!%p1914_p10)
}
  0x39   :  { %89 = dma.hbm_to_vmem [thread:$0]  %s2487_s7, 4096, %s84_s23, [#allocation11], %s2067_s17, %s2067_s17, %s2068_s18  }
  0x3a   :  { %s2071_s13 = smov [#allocation13]  }
  0x3b   :  { %s97_s14 = sshll.u32 %s2071_s13, 4  ;;  %s98_s14 = int_to_ptr.vmem [resolvable:$true] %s97_s14 }
  0x3c   :  { %s1926_s15 = scalar_lea.vmem %s98_s14, 2048  ;;  %p1931_p12 = scmp.lt.s32.totalorder %s98_s14, %s98_s14 }
  0x3d   :  { %p1927_p11 = scmp.ne.s32.totalorder %s98_s14, %s1926_s15  ;;  %p1932_p13 = scmp.lt.s32.totalorder %s1926_s15, %s1926_s15 }
  0x3f   :  { %p1933_p0 = por %p1932_p13, %p1931_p12 }
  0x41   :  { %p1934_p1 = pnand %p1933_p0, %p1927_p11 }
  0x43   :  { %1937 = shalt.err (!%p1934_p1)
}
  0x44   :  { %103 = dma.hbm_to_vmem [thread:$0]  %s2489_s9, 2048, %s98_s14, [#allocation14], %s2067_s17, %s2067_s17, %s2068_s18  }
  0x45   :  { %2014 = dma.done.wait [#allocation5], 1024  }
  0x46   :  { %2015 = vsyncadd [#allocation5], 4294966272 }
  0x47   :  { %2016 = dma.done.wait [#allocation8], 16384  }
  0x48   :  { %2017 = vsyncadd [#allocation8], 4294950912 }
  0x49   :  { %2018 = dma.done.wait [#allocation11], 20480  }
  0x4a   :  { %2019 = vsyncadd [#allocation11], 4294946816 }
  0x4b   :  { %2020 = dma.done.wait [#allocation14], 2048  }
  0x4c   :  { %2021 = vsyncadd [#allocation14], 4294965248  ;;  %v2072_v0 = vmov 0.0   ;;  %v2188_v1 = vld [vmem:[%s2481_s1] sm:$0xff]  ;;  %v198_v6 = vld [vmem:[#allocation7 + $0x1e8] sm:$0xff]  ;;  %s2228_s1 = smov 0  }
  0x4d   :  { %265 = vmatprep.mubr.f32.mxu0 %v2072_v0  ;;  %378 = vmatprep.mubr.f32.mxu1 %v2072_v0  ;;  %v2193_v2 = vld [vmem:[%s2484_s4] sm:$0xf]  ;;  %v200_v7 = vld [vmem:[#allocation7 + $0x1f8] sm:$0xff]  ;;  %v199_v9 = vld [vmem:[#allocation7 + $0x1f0] sm:$0xff] }
  0x4e   :  { %v2198_v3 = vld [vmem:[%s2486_s6] sm:$0xf]  ;;  %201 = vmatprep.subr.mxu0 %v198_v6  ;;  %314 = vmatprep.subr.mxu1 %v200_v7  ;;  %v194_v10 = vld [vmem:[#allocation7 + $0x1c8] sm:$0xff]  ;;  %v196_v11 = vld [vmem:[#allocation7 + $0x1d8] sm:$0xff] }
  0x4f   :  { %v2203_v4 = vld [vmem:[%s2488_s8] ss:$0 sm:$0xff]  ;;  %315 = vmatpush1.msra.mxu1 %v199_v9  ;;  %v195_v13 = vld [vmem:[#allocation7 + $0x1d0] sm:$0xff]  ;;  %v190_v14 = vld [vmem:[#allocation7 + $0x1a8] sm:$0xff] }
  0x50   :  { %v2208_v5 = vld [vmem:[%s2490_s10] ss:$0 sm:$0xff]  ;;  %v192_v15 = vld [vmem:[#allocation7 + $0x1b8] sm:$0xff]  ;;  %316 = vmatprep.subr.mxu1 %v196_v11  ;;  %v191_v17 = vld [vmem:[#allocation7 + $0x1b0] sm:$0xff] }
  0x51   :  { %v197_v8 = vld [vmem:[#allocation7 + $0x1e0] sm:$0xff]  ;;  %v186_v18 = vld [vmem:[#allocation7 + $0x188] sm:$0xff]  ;;  %317 = vmatpush1.msra.mxu1 %v195_v13  ;;  %v188_v19 = vld [vmem:[#allocation7 + $0x198] sm:$0xff] }
  0x52   :  { %202 = vmatpush1.msra.mxu0 %v197_v8  ;;  %v193_v12 = vld [vmem:[#allocation7 + $0x1c0] sm:$0xff]  ;;  %318 = vmatprep.subr.mxu1 %v192_v15  ;;  %v187_v21 = vld [vmem:[#allocation7 + $0x190] sm:$0xff]  ;;  %v182_v22 = vld [vmem:[#allocation7 + $0x168] sm:$0xff] }
  0x53   :  { %203 = vmatprep.subr.mxu0 %v194_v10  ;;  %v189_v16 = vld [vmem:[#allocation7 + $0x1a0] sm:$0xff]  ;;  %319 = vmatpush1.msra.mxu1 %v191_v17  ;;  %v184_v23 = vld [vmem:[#allocation7 + $0x178] sm:$0xff]  ;;  %v183_v25 = vld [vmem:[#allocation7 + $0x170] sm:$0xff] }
  0x54   :  { %204 = vmatpush1.msra.mxu0 %v193_v12  ;;  %v185_v20 = vld [vmem:[#allocation7 + $0x180] sm:$0xff]  ;;  %320 = vmatprep.subr.mxu1 %v188_v19  ;;  %v178_v26 = vld [vmem:[#allocation7 + $0x148] sm:$0xff]  ;;  %v180_v27 = vld [vmem:[#allocation7 + $0x158] sm:$0xff] }
  0x55   :  { %205 = vmatprep.subr.mxu0 %v190_v14  ;;  %v181_v24 = vld [vmem:[#allocation7 + $0x160] sm:$0xff]  ;;  %321 = vmatpush1.msra.mxu1 %v187_v21  ;;  %v179_v29 = vld [vmem:[#allocation7 + $0x150] sm:$0xff]  ;;  %v174_v30 = vld [vmem:[#allocation7 + $0x128] sm:$0xff] }
  0x56   :  { %206 = vmatpush1.msra.mxu0 %v189_v16  ;;  %v177_v28 = vld [vmem:[#allocation7 + $0x140] sm:$0xff]  ;;  %322 = vmatprep.subr.mxu1 %v184_v23  ;;  %v176_v31 = vld [vmem:[#allocation7 + $0x138] sm:$0xff]  ;;  %v175_v33 = vld [vmem:[#allocation7 + $0x130] sm:$0xff] }
  0x57   :  { %207 = vmatprep.subr.mxu0 %v186_v18  ;;  %323 = vmatpush1.msra.mxu1 %v183_v25  ;;  %v173_v32 = vld [vmem:[#allocation7 + $0x120] sm:$0xff]  ;;  %v170_v34 = vld [vmem:[#allocation7 + $0x108] sm:$0xff]  ;;  %v172_v35 = vld [vmem:[#allocation7 + $0x118] sm:$0xff] }
  0x58   :  { %208 = vmatpush1.msra.mxu0 %v185_v20  ;;  %324 = vmatprep.subr.mxu1 %v180_v27  ;;  %v169_v36 = vld [vmem:[#allocation7 + $0x100] sm:$0xff]  ;;  %v171_v37 = vld [vmem:[#allocation7 + $0x110] sm:$0xff]  ;;  %v166_v38 = vld [vmem:[#allocation7 + $0xe8] sm:$0xff] }
  0x59   :  { %209 = vmatprep.subr.mxu0 %v182_v22  ;;  %325 = vmatpush1.msra.mxu1 %v179_v29  ;;  %v168_v39 = vld [vmem:[#allocation7 + $0xf8] sm:$0xff]  ;;  %v165_v40 = vld [vmem:[#allocation7 + $0xe0] sm:$0xff]  ;;  %v167_v41 = vld [vmem:[#allocation7 + $0xf0] sm:$0xff] }
  0x5a   :  { %210 = vmatpush1.msra.mxu0 %v181_v24  ;;  %326 = vmatprep.subr.mxu1 %v176_v31  ;;  %v162_v42 = vld [vmem:[#allocation7 + $0xc8] sm:$0xff]  ;;  %v164_v43 = vld [vmem:[#allocation7 + $0xd8] sm:$0xff]  ;;  %v161_v44 = vld [vmem:[#allocation7 + $0xc0] sm:$0xff] }
  0x5b   :  { %211 = vmatprep.subr.mxu0 %v178_v26  ;;  %327 = vmatpush1.msra.mxu1 %v175_v33  ;;  %v163_v45 = vld [vmem:[#allocation7 + $0xd0] sm:$0xff]  ;;  %v158_v46 = vld [vmem:[#allocation7 + $0xa8] sm:$0xff]  ;;  %v160_v47 = vld [vmem:[#allocation7 + $0xb8] sm:$0xff] }
  0x5c   :  { %212 = vmatpush1.msra.mxu0 %v177_v28  ;;  %328 = vmatprep.subr.mxu1 %v172_v35  ;;  %v157_v48 = vld [vmem:[#allocation7 + $0xa0] sm:$0xff]  ;;  %v159_v49 = vld [vmem:[#allocation7 + $0xb0] sm:$0xff]  ;;  %v154_v50 = vld [vmem:[#allocation7 + $0x88] sm:$0xff] }
  0x5d   :  { %213 = vmatprep.subr.mxu0 %v174_v30  ;;  %329 = vmatpush1.msra.mxu1 %v171_v37  ;;  %v156_v51 = vld [vmem:[#allocation7 + $0x98] sm:$0xff]  ;;  %v153_v52 = vld [vmem:[#allocation7 + $0x80] sm:$0xff]  ;;  %v155_v53 = vld [vmem:[#allocation7 + $0x90] sm:$0xff] }
  0x5e   :  { %214 = vmatpush1.msra.mxu0 %v173_v32  ;;  %330 = vmatprep.subr.mxu1 %v168_v39  ;;  %v150_v54 = vld [vmem:[#allocation7 + $0x68] sm:$0xff]  ;;  %v152_v55 = vld [vmem:[#allocation7 + $0x78] sm:$0xff]  ;;  %v149_v56 = vld [vmem:[#allocation7 + $0x60] sm:$0xff] }
  0x5f   :  { %215 = vmatprep.subr.mxu0 %v170_v34  ;;  %331 = vmatpush1.msra.mxu1 %v167_v41  ;;  %v151_v57 = vld [vmem:[#allocation7 + $0x70] sm:$0xff]  ;;  %v146_v58 = vld [vmem:[#allocation7 + $0x48] sm:$0xff]  ;;  %v148_v59 = vld [vmem:[#allocation7 + $0x58] sm:$0xff] }
  0x60   :  { %216 = vmatpush1.msra.mxu0 %v169_v36  ;;  %332 = vmatprep.subr.mxu1 %v164_v43  ;;  %v145_v60 = vld [vmem:[#allocation7 + $0x40] sm:$0xff]  ;;  %v147_v61 = vld [vmem:[#allocation7 + $0x50] sm:$0xff]  ;;  %v142_v62 = vld [vmem:[#allocation7 + $0x28] sm:$0xff] }
  0x61   :  { %217 = vmatprep.subr.mxu0 %v166_v38  ;;  %333 = vmatpush1.msra.mxu1 %v163_v45  ;;  %v144_v63 = vld [vmem:[#allocation7 + $0x38] sm:$0xff]  ;;  %v141_v6 = vld [vmem:[#allocation7 + $0x20] sm:$0xff]  ;;  %v143_v7 = vld [vmem:[#allocation7 + $0x30] sm:$0xff] }
  0x62   :  { %218 = vmatpush1.msra.mxu0 %v165_v40  ;;  %334 = vmatprep.subr.mxu1 %v160_v47  ;;  %v138_v8 = vld [vmem:[#allocation7 + $0x8] sm:$0xff]  ;;  %v140_v9 = vld [vmem:[#allocation7 + $0x18] sm:$0xff]  ;;  %v137_v10 = vld [vmem:[#allocation7] sm:$0xff] }
  0x63   :  { %219 = vmatprep.subr.mxu0 %v162_v42  ;;  %335 = vmatpush1.msra.mxu1 %v159_v49  ;;  %v139_v11 = vld [vmem:[#allocation7 + $0x10] sm:$0xff]  ;;  %v129_v12 = vld [vmem:[#allocation4] sm:$0xff]  ;;  %v130_v13 = vld [vmem:[#allocation4 + $0x8] sm:$0xff] }
  0x64   :  { %220 = vmatpush1.msra.mxu0 %v161_v44  ;;  %336 = vmatprep.subr.mxu1 %v156_v51  ;;  %v131_v14 = vld [vmem:[#allocation4 + $0x10] sm:$0xff]  ;;  %v132_v15 = vld [vmem:[#allocation4 + $0x18] sm:$0xff]  ;;  %v133_v16 = vld [vmem:[#allocation4 + $0x20] sm:$0xff]  ;;  %v2224_v51 = vmov 0.0  }
  0x65   :  { %221 = vmatprep.subr.mxu0 %v158_v46  ;;  %337 = vmatpush1.msra.mxu1 %v155_v53  ;;  %v134_v17 = vld [vmem:[#allocation4 + $0x28] sm:$0xff]  ;;  %v135_v18 = vld [vmem:[#allocation4 + $0x30] sm:$0xff]  ;;  %v136_v19 = vld [vmem:[#allocation4 + $0x38] sm:$0xff] }
  0x66   :  { %222 = vmatpush1.msra.mxu0 %v157_v48  ;;  %338 = vmatprep.subr.mxu1 %v152_v55 }
  0x67   :  { %223 = vmatprep.subr.mxu0 %v154_v50  ;;  %339 = vmatpush1.msra.mxu1 %v151_v57 }
  0x68   :  { %224 = vmatpush1.msra.mxu0 %v153_v52  ;;  %340 = vmatprep.subr.mxu1 %v148_v59  ;;  %v2226_v52 = vmov 0.0  }
  0x69   :  { %225 = vmatprep.subr.mxu0 %v150_v54  ;;  %341 = vmatpush1.msra.mxu1 %v147_v61 }
  0x6a   :  { %226 = vmatpush1.msra.mxu0 %v149_v56  ;;  %342 = vmatprep.subr.mxu1 %v144_v63 }
  0x6b   :  { %227 = vmatprep.subr.mxu0 %v146_v58  ;;  %343 = vmatpush1.msra.mxu1 %v143_v7 }
  0x6c   :  { %228 = vmatpush1.msra.mxu0 %v145_v60  ;;  %344 = vmatprep.subr.mxu1 %v140_v9 }
  0x6d   :  { %229 = vmatprep.subr.mxu0 %v142_v62  ;;  %345 = vmatpush1.msra.mxu1 %v139_v11 }
  0x6e   :  { %230 = vmatpush1.msra.mxu0 %v141_v6  ;;  %379 = vmatmul.mubr.f32.vlgmr.msra.gmra.mxu1 %v129_v12 }
  0x6f   :  { %231 = vmatprep.subr.mxu0 %v138_v8  ;;  %384 = vmatprep.mubr.f32.mxu1 %v2072_v0 }
  0x70   :  { %232 = vmatpush1.msra.mxu0 %v137_v10 }
  0x71   :  { %266 = vmatmul.mubr.f32.vlgmr.msra.gmra.mxu0 %v129_v12 }
  0x72   :  { %271 = vmatprep.mubr.f32.mxu0 %v2072_v0  ;;  %385 = vmatmul.mubr.f32.gmra.mxu1 %v130_v13 }
  0x73   :  { %390 = vmatprep.mubr.f32.mxu1 %v2072_v0 }
  0x75   :  { %272 = vmatmul.mubr.f32.gmra.mxu0 %v130_v13 }
  0x76   :  { %277 = vmatprep.mubr.f32.mxu0 %v2072_v0  ;;  %391 = vmatmul.mubr.f32.gmra.mxu1 %v131_v14 }
  0x77   :  { %396 = vmatprep.mubr.f32.mxu1 %v2072_v0 }
  0x79   :  { %278 = vmatmul.mubr.f32.gmra.mxu0 %v131_v14 }
  0x7a   :  { %283 = vmatprep.mubr.f32.mxu0 %v2072_v0  ;;  %397 = vmatmul.mubr.f32.gmra.mxu1 %v132_v15 }
  0x7b   :  { %402 = vmatprep.mubr.f32.mxu1 %v2072_v0 }
  0x7d   :  { %284 = vmatmul.mubr.f32.gmra.mxu0 %v132_v15 }
  0x7e   :  { %289 = vmatprep.mubr.f32.mxu0 %v2072_v0  ;;  %403 = vmatmul.mubr.f32.gmra.mxu1 %v133_v16 }
  0x7f   :  { %408 = vmatprep.mubr.f32.mxu1 %v2072_v0 }
  0x81   :  { %290 = vmatmul.mubr.f32.gmra.mxu0 %v133_v16 }
  0x82   :  { %295 = vmatprep.mubr.f32.mxu0 %v2072_v0  ;;  %409 = vmatmul.mubr.f32.gmra.mxu1 %v134_v17 }
  0x83   :  { %414 = vmatprep.mubr.f32.mxu1 %v2072_v0 }
  0x85   :  { %296 = vmatmul.mubr.f32.gmra.mxu0 %v134_v17 }
  0x86   :  { %301 = vmatprep.mubr.f32.mxu0 %v2072_v0  ;;  %415 = vmatmul.mubr.f32.gmra.mxu1 %v135_v18 }
  0x87   :  { %420 = vmatprep.mubr.f32.mxu1 %v2072_v0 }
  0x89   :  { %302 = vmatmul.mubr.f32.gmra.mxu0 %v135_v18 }
  0x8a   :  { %307 = vmatprep.mubr.f32.mxu0 %v2072_v0  ;;  %421 = vmatmul.mubr.f32.gmra.mxu1 %v136_v19 }
  0x8d   :  { %308 = vmatmul.mubr.f32.gmra.mxu0 %v136_v19 }
 0x12e   :  { %v380_v21 = vpop.f32.mrf.mxu1 }
 0x12f   :  { %429 = vst [vmem:[#allocation2 + $0x10] sm:$0xff] %v380_v21 }
 0x130   :  { %v382_v23 = vpop.f32.mrf.mxu1 }
 0x131   :  { %v267_v20 = vpop.f32.mrf.mxu0  ;;  %430 = vst [vmem:[#allocation2 + $0x18] sm:$0xff] %v382_v23 }
 0x132   :  { %427 = vst [vmem:[#allocation2] sm:$0xff] %v267_v20  ;;  %v386_v25 = vpop.f32.mrf.mxu1 }
 0x133   :  { %v269_v22 = vpop.f32.mrf.mxu0  ;;  %433 = vst [vmem:[#allocation2 + $0x30] sm:$0xff] %v386_v25 }
 0x134   :  { %428 = vst [vmem:[#allocation2 + $0x8] sm:$0xff] %v269_v22  ;;  %v388_v27 = vpop.f32.mrf.mxu1 }
 0x135   :  { %v273_v24 = vpop.f32.mrf.mxu0  ;;  %434 = vst [vmem:[#allocation2 + $0x38] sm:$0xff] %v388_v27 }
 0x136   :  { %431 = vst [vmem:[#allocation2 + $0x20] sm:$0xff] %v273_v24  ;;  %v392_v0 = vpop.f32.mrf.mxu1 }
 0x137   :  { %v275_v26 = vpop.f32.mrf.mxu0  ;;  %437 = vst [vmem:[#allocation2 + $0x50] sm:$0xff] %v392_v0 }
 0x138   :  { %432 = vst [vmem:[#allocation2 + $0x28] sm:$0xff] %v275_v26  ;;  %v394_v30 = vpop.f32.mrf.mxu1 }
 0x139   :  { %v279_v28 = vpop.f32.mrf.mxu0  ;;  %438 = vst [vmem:[#allocation2 + $0x58] sm:$0xff] %v394_v30 }
 0x13a   :  { %435 = vst [vmem:[#allocation2 + $0x40] sm:$0xff] %v279_v28  ;;  %v398_v32 = vpop.f32.mrf.mxu1 }
 0x13b   :  { %v281_v29 = vpop.f32.mrf.mxu0  ;;  %441 = vst [vmem:[#allocation2 + $0x70] sm:$0xff] %v398_v32 }
 0x13c   :  { %436 = vst [vmem:[#allocation2 + $0x48] sm:$0xff] %v281_v29  ;;  %v400_v34 = vpop.f32.mrf.mxu1 }
 0x13d   :  { %v285_v31 = vpop.f32.mrf.mxu0  ;;  %442 = vst [vmem:[#allocation2 + $0x78] sm:$0xff] %v400_v34 }
 0x13e   :  { %439 = vst [vmem:[#allocation2 + $0x60] sm:$0xff] %v285_v31  ;;  %v404_v36 = vpop.f32.mrf.mxu1 }
 0x13f   :  { %v287_v33 = vpop.f32.mrf.mxu0  ;;  %445 = vst [vmem:[#allocation2 + $0x90] sm:$0xff] %v404_v36 }
 0x140   :  { %440 = vst [vmem:[#allocation2 + $0x68] sm:$0xff] %v287_v33  ;;  %v406_v38 = vpop.f32.mrf.mxu1 }
 0x141   :  { %v291_v35 = vpop.f32.mrf.mxu0  ;;  %446 = vst [vmem:[#allocation2 + $0x98] sm:$0xff] %v406_v38 }
 0x142   :  { %443 = vst [vmem:[#allocation2 + $0x80] sm:$0xff] %v291_v35  ;;  %v410_v40 = vpop.f32.mrf.mxu1 }
 0x143   :  { %v293_v37 = vpop.f32.mrf.mxu0  ;;  %449 = vst [vmem:[#allocation2 + $0xb0] sm:$0xff] %v410_v40 }
 0x144   :  { %444 = vst [vmem:[#allocation2 + $0x88] sm:$0xff] %v293_v37  ;;  %v412_v42 = vpop.f32.mrf.mxu1 }
 0x145   :  { %v297_v39 = vpop.f32.mrf.mxu0  ;;  %450 = vst [vmem:[#allocation2 + $0xb8] sm:$0xff] %v412_v42 }
 0x146   :  { %447 = vst [vmem:[#allocation2 + $0xa0] sm:$0xff] %v297_v39  ;;  %v416_v44 = vpop.f32.mrf.mxu1 }
 0x147   :  { %v299_v41 = vpop.f32.mrf.mxu0  ;;  %453 = vst [vmem:[#allocation2 + $0xd0] sm:$0xff] %v416_v44 }
 0x148   :  { %448 = vst [vmem:[#allocation2 + $0xa8] sm:$0xff] %v299_v41  ;;  %v418_v46 = vpop.f32.mrf.mxu1 }
 0x149   :  { %v303_v43 = vpop.f32.mrf.mxu0  ;;  %454 = vst [vmem:[#allocation2 + $0xd8] sm:$0xff] %v418_v46 }
 0x14a   :  { %451 = vst [vmem:[#allocation2 + $0xc0] sm:$0xff] %v303_v43  ;;  %v422_v48 = vpop.f32.mrf.mxu1 }
 0x14b   :  { %v305_v45 = vpop.f32.mrf.mxu0  ;;  %457 = vst [vmem:[#allocation2 + $0xf0] sm:$0xff] %v422_v48 }
 0x14c   :  { %452 = vst [vmem:[#allocation2 + $0xc8] sm:$0xff] %v305_v45  ;;  %v424_v50 = vpop.f32.mrf.mxu1 }
 0x14d   :  { %v309_v47 = vpop.f32.mrf.mxu0  ;;  %458 = vst [vmem:[#allocation2 + $0xf8] sm:$0xff] %v424_v50 }
 0x14e   :  { %455 = vst [vmem:[#allocation2 + $0xe0] sm:$0xff] %v309_v47 }
 0x14f   :  { %v311_v49 = vpop.f32.mrf.mxu0 }
 0x150   :  { %456 = vst [vmem:[#allocation2 + $0xe8] sm:$0xff] %v311_v49 }
 0x151 LB: > { %v538_v53 = vld [vmem:[#allocation9 + $0x1e8] sm:$0xff]  ;;  %v537_v54 = vld [vmem:[#allocation9 + $0x1e0] sm:$0xff]  ;;  %v2073_v57 = vmov 0.0   ;;  %v736_v59 = vstv %s2036_s1  ;;  %v2074_v61 = vmov 0   ;;  %v540_v7 = vld [vmem:[#allocation9 + $0x1f8] sm:$0xff]  ;;  %s1565_s4 = sshll.u32 %s2036_s1, 3  ;;  %s2036_s1 = sphi %s2228_s1, %s464_s1   ;;  %v2032_v52 = vphi %v2226_v52, %v2494_v52   ;;  %v2028_v51 = vphi %v2224_v51, %v2493_v51  }
 0x152   : > { %v534_v55 = vld [vmem:[#allocation9 + $0x1c8] sm:$0xff]  ;;  %541 = vmatprep.subr.mxu0 %v538_v53  ;;  %v533_v56 = vld [vmem:[#allocation9 + $0x1c0] sm:$0xff]  ;;  %605 = vmatprep.mubr.f32.mxu0 %v2073_v57  ;;  %vm737_vm0 = vcmp.lt.s32.totalorder %v736_v59, %v2188_v1  ;;  %v539_v9 = vld [vmem:[#allocation9 + $0x1f0] sm:$0xff]  ;;  %s468_s6 = sshra.s32 %s1565_s4, 3  ;;  %s744_s22 = scalar_lea.vmem [#allocation3], %s1565_s4 }
 0x153   : > { %542 = vmatpush1.msra.mxu0 %v537_v54  ;;  %v530_v58 = vld [vmem:[#allocation9 + $0x1a8] sm:$0xff]  ;;  %676 = vmatprep.mubr.f32.mxu1 %v2073_v57  ;;  %v529_v60 = vld [vmem:[#allocation9 + $0x1a0] sm:$0xff]  ;;  %v738_v63 = vsel %vm737_vm0, 1, %v2074_v61  ;;  %v536_v11 = vld [vmem:[#allocation9 + $0x1d8] sm:$0xff]  ;;  %s1579_s8 = sshll.u32 %s468_s6, 5  ;;  %s464_s1 = sadd.s32 1, %s2036_s1  }
 0x154   : > { %543 = vmatprep.subr.mxu0 %v534_v55  ;;  %1759 = vset.pattern.permute.xlu0 %v2074_v61  ;;  %v526_v62 = vld [vmem:[#allocation9 + $0x188] sm:$0xff]  ;;  %v525_v6 = vld [vmem:[#allocation9 + $0x180] sm:$0xff]  ;;  %v535_v12 = vld [vmem:[#allocation9 + $0x1d0] sm:$0xff]  ;;  %s472_s10 = scalar_lea.vmem [#allocation2], %s1579_s8  ;;  %p461_p2 = scmp.ge.s32.totalorder %s464_s1, 8  }
 0x155   : > { %544 = vmatpush1.msra.mxu0 %v533_v56  ;;  %740 = vperm.xlu0 %1759, %v738_v63   ;;  %v522_v8 = vld [vmem:[#allocation9 + $0x168] sm:$0xff]  ;;  %v521_v10 = vld [vmem:[#allocation9 + $0x160] sm:$0xff]  ;;  %v532_v14 = vld [vmem:[#allocation9 + $0x1b8] sm:$0xff]  ;;  %vm750_vm2 = vcmask (%p461_p2), 7168   ;;  %s2308_s5 = smov (%p461_p2), 0  }
 0x156   : > { %545 = vmatprep.subr.mxu0 %v530_v58  ;;  %612 = vmatprep.subr.mxu1 %v540_v7  ;;  %v518_v13 = vld [vmem:[#allocation9 + $0x148] sm:$0xff]  ;;  %v517_v15 = vld [vmem:[#allocation9 + $0x140] sm:$0xff]  ;;  %v531_v16 = vld [vmem:[#allocation9 + $0x1b0] sm:$0xff] }
 0x157   : > { %546 = vmatpush1.msra.mxu0 %v529_v60  ;;  %613 = vmatpush1.msra.mxu1 %v539_v9  ;;  %v528_v17 = vld [vmem:[#allocation9 + $0x198] sm:$0xff]  ;;  %v514_v18 = vld [vmem:[#allocation9 + $0x128] sm:$0xff]  ;;  %v527_v19 = vld [vmem:[#allocation9 + $0x190] sm:$0xff] }
 0x158   : > { %547 = vmatprep.subr.mxu0 %v526_v62  ;;  %614 = vmatprep.subr.mxu1 %v536_v11  ;;  %v513_v20 = vld [vmem:[#allocation9 + $0x120] sm:$0xff]  ;;  %v524_v21 = vld [vmem:[#allocation9 + $0x178] sm:$0xff]  ;;  %v510_v22 = vld [vmem:[#allocation9 + $0x108] sm:$0xff] }
 0x159   : > { %548 = vmatpush1.msra.mxu0 %v525_v6  ;;  %615 = vmatpush1.msra.mxu1 %v535_v12  ;;  %v523_v23 = vld [vmem:[#allocation9 + $0x170] sm:$0xff]  ;;  %v509_v24 = vld [vmem:[#allocation9 + $0x100] sm:$0xff]  ;;  %v520_v25 = vld [vmem:[#allocation9 + $0x158] sm:$0xff]  ;;  %v688_v6 = vlaneseq }
 0x15a   : > { %549 = vmatprep.subr.mxu0 %v522_v8  ;;  %616 = vmatprep.subr.mxu1 %v532_v14  ;;  %v506_v26 = vld [vmem:[#allocation9 + $0xe8] sm:$0xff]  ;;  %v519_v27 = vld [vmem:[#allocation9 + $0x150] sm:$0xff]  ;;  %v505_v28 = vld [vmem:[#allocation9 + $0xe0] sm:$0xff] }
 0x15b   : > { %550 = vmatpush1.msra.mxu0 %v521_v10  ;;  %617 = vmatpush1.msra.mxu1 %v531_v16  ;;  %v516_v0 = vld [vmem:[#allocation9 + $0x138] sm:$0xff]  ;;  %v502_v29 = vld [vmem:[#allocation9 + $0xc8] sm:$0xff]  ;;  %v515_v30 = vld [vmem:[#allocation9 + $0x130] sm:$0xff]  ;;  %v2247_v7 = vshrl.u32 %v688_v6, 7 }
 0x15c   : > { %551 = vmatprep.subr.mxu0 %v518_v13  ;;  %618 = vmatprep.subr.mxu1 %v528_v17  ;;  %v501_v31 = vld [vmem:[#allocation9 + $0xc0] sm:$0xff]  ;;  %v512_v32 = vld [vmem:[#allocation9 + $0x118] sm:$0xff]  ;;  %v498_v33 = vld [vmem:[#allocation9 + $0xa8] sm:$0xff] }
 0x15d   : > { %552 = vmatpush1.msra.mxu0 %v517_v15  ;;  %619 = vmatpush1.msra.mxu1 %v527_v19  ;;  %v511_v34 = vld [vmem:[#allocation9 + $0x110] sm:$0xff]  ;;  %v497_v35 = vld [vmem:[#allocation9 + $0xa0] sm:$0xff]  ;;  %v508_v36 = vld [vmem:[#allocation9 + $0xf8] sm:$0xff]  ;;  %v690_v8 = vsub.s32 0, %v2247_v7  ;;  %v694_v9 = vsub.s32 1, %v2247_v7 }
 0x15e   : > { %553 = vmatprep.subr.mxu0 %v514_v18  ;;  %620 = vmatprep.subr.mxu1 %v524_v21  ;;  %v494_v37 = vld [vmem:[#allocation9 + $0x88] sm:$0xff]  ;;  %v507_v38 = vld [vmem:[#allocation9 + $0xf0] sm:$0xff]  ;;  %v493_v39 = vld [vmem:[#allocation9 + $0x80] sm:$0xff] }
 0x15f   : > { %554 = vmatpush1.msra.mxu0 %v513_v20  ;;  %621 = vmatpush1.msra.mxu1 %v523_v23  ;;  %v504_v40 = vld [vmem:[#allocation9 + $0xd8] sm:$0xff]  ;;  %v490_v41 = vld [vmem:[#allocation9 + $0x68] sm:$0xff]  ;;  %v503_v42 = vld [vmem:[#allocation9 + $0xd0] sm:$0xff]  ;;  %v691_v11 = vrot.slane %v2193_v2, %v690_v8  ;;  %v695_v15 = vrot.slane %v2193_v2, %v694_v9 }
 0x160   : > { %555 = vmatprep.subr.mxu0 %v510_v22  ;;  %622 = vmatprep.subr.mxu1 %v520_v25  ;;  %v489_v43 = vld [vmem:[#allocation9 + $0x60] sm:$0xff]  ;;  %v500_v44 = vld [vmem:[#allocation9 + $0xb8] sm:$0xff]  ;;  %v486_v45 = vld [vmem:[#allocation9 + $0x48] sm:$0xff]  ;;  %v702_v22 = vsub.s32 3, %v2247_v7 }
 0x161   : > { %556 = vmatpush1.msra.mxu0 %v509_v24  ;;  %623 = vmatpush1.msra.mxu1 %v519_v27  ;;  %v499_v46 = vld [vmem:[#allocation9 + $0xb0] sm:$0xff]  ;;  %v485_v47 = vld [vmem:[#allocation9 + $0x40] sm:$0xff]  ;;  %v496_v48 = vld [vmem:[#allocation9 + $0x98] sm:$0xff] }
 0x162   : > { %557 = vmatprep.subr.mxu0 %v506_v26  ;;  %624 = vmatprep.subr.mxu1 %v516_v0  ;;  %v482_v49 = vld [vmem:[#allocation9 + $0x28] sm:$0xff]  ;;  %v495_v50 = vld [vmem:[#allocation9 + $0x90] sm:$0xff]  ;;  %v481_v53 = vld [vmem:[#allocation9 + $0x20] sm:$0xff]  ;;  %v698_v26 = vsub.s32 2, %v2247_v7  ;;  %v703_v0 = vrot.slane %v2193_v2, %v702_v22 }
 0x163   : > { %558 = vmatpush1.msra.mxu0 %v505_v28  ;;  %625 = vmatpush1.msra.mxu1 %v515_v30  ;;  %v492_v54 = vld [vmem:[#allocation9 + $0x78] sm:$0xff]  ;;  %v478_v55 = vld [vmem:[#allocation9 + $0x8] sm:$0xff]  ;;  %v491_v56 = vld [vmem:[#allocation9 + $0x70] sm:$0xff] }
 0x164   : > { %559 = vmatprep.subr.mxu0 %v502_v29  ;;  %626 = vmatprep.subr.mxu1 %v512_v32  ;;  %v477_v57 = vld [vmem:[#allocation9] sm:$0xff]  ;;  %v488_v58 = vld [vmem:[#allocation9 + $0x58] sm:$0xff]  ;;  %v487_v59 = vld [vmem:[#allocation9 + $0x50] sm:$0xff]  ;;  %v699_v30 = vrot.slane %v2193_v2, %v698_v26  ;;  %v2075_v2 = vmov (%p461_p2), -1e+30  }
 0x165   : > { %560 = vmatpush1.msra.mxu0 %v501_v31  ;;  %627 = vmatpush1.msra.mxu1 %v511_v34  ;;  %v484_v60 = vld [vmem:[#allocation9 + $0x38] sm:$0xff]  ;;  %v483_v61 = vld [vmem:[#allocation9 + $0x30] sm:$0xff]  ;;  %v473_v10 = vld [vmem:[%s472_s10] sm:$0xff] }
 0x166   : > { %561 = vmatprep.subr.mxu0 %v498_v33  ;;  %628 = vmatprep.subr.mxu1 %v508_v36  ;;  %v480_v62 = vld [vmem:[#allocation9 + $0x18] sm:$0xff]  ;;  %v479_v63 = vld [vmem:[#allocation9 + $0x10] sm:$0xff]  ;;  %v474_v13 = vld [vmem:[%s472_s10 + $0x8] sm:$0xff] }
 0x167   : > { %562 = vmatpush1.msra.mxu0 %v497_v35  ;;  %629 = vmatpush1.msra.mxu1 %v507_v38  ;;  %v476_v24 = vld [vmem:[%s472_s10 + $0x18] sm:$0xff]  ;;  %v475_v27 = vld [vmem:[%s472_s10 + $0x10] sm:$0xff] }
 0x168   : > { %563 = vmatprep.subr.mxu0 %v494_v37  ;;  %630 = vmatprep.subr.mxu1 %v504_v40 }
 0x169   : > { %564 = vmatpush1.msra.mxu0 %v493_v39  ;;  %631 = vmatpush1.msra.mxu1 %v503_v42 }
 0x16a   : > { %565 = vmatprep.subr.mxu0 %v490_v41  ;;  %632 = vmatprep.subr.mxu1 %v500_v44 }
 0x16b   : > { %566 = vmatpush1.msra.mxu0 %v489_v43  ;;  %633 = vmatpush1.msra.mxu1 %v499_v46 }
 0x16c   : > { %567 = vmatprep.subr.mxu0 %v486_v45  ;;  %634 = vmatprep.subr.mxu1 %v496_v48 }
 0x16d   : > { %568 = vmatpush1.msra.mxu0 %v485_v47  ;;  %635 = vmatpush1.msra.mxu1 %v495_v50 }
 0x16e   : > { %569 = vmatprep.subr.mxu0 %v482_v49  ;;  %636 = vmatprep.subr.mxu1 %v492_v54 }
 0x16f   : > { %570 = vmatpush1.msra.mxu0 %v481_v53  ;;  %637 = vmatpush1.msra.mxu1 %v491_v56 }
 0x170   : > { %571 = vmatprep.subr.mxu0 %v478_v55  ;;  %638 = vmatprep.subr.mxu1 %v488_v58  ;;  %v2278_v55 = vand.u32 (%p461_p2), 127, %v688_v6 }
 0x171   : > { %572 = vmatpush1.msra.mxu0 %v477_v57  ;;  %639 = vmatpush1.msra.mxu1 %v487_v59 }
 0x172   : > { %606 = vmatmul.mubr.f32.vlgmr.msra.gmra.mxu0 %v2032_v52  ;;  %640 = vmatprep.subr.mxu1 %v484_v60 }
 0x173   : > { %641 = vmatpush1.msra.mxu1 %v483_v61 }
 0x174   : > { %642 = vmatprep.subr.mxu1 %v480_v62 }
 0x175   : > { %643 = vmatpush1.msra.mxu1 %v479_v63 }
 0x176   : > { %677 = vmatmul.mubr.f32.vlgmr.msra.gmra.mxu1 %v2032_v52 }
 0x1d0   : > { %v741_v41 = vpop.permute.xlu0 %740 }
 0x1d1   : > { %vm742_vm1 = vcmp.eq.s32.totalorder %v741_v41, 1 }
 0x232   : > { %v607_v12 = vpop.f32.mrf.mxu0 }
 0x233   : > { %v683_v14 = vadd.f32 %v607_v12, %v473_v10 }
 0x234   : > { %v609_v16 = vpop.f32.mrf.mxu0 }
 0x235   : > { %v708_v17 = vadd.f32 %v691_v11, %v683_v14  ;;  %v684_v18 = vadd.f32 %v609_v16, %v474_v13  ;;  %v2298_v13 = vmov (%p461_p2), 0.0   ;;  %v2300_v14 = vmov (%p461_p2), 0  }
 0x236   : > { %v678_v21 = vpop.f32.mrf.mxu1 }
 0x237   : > { %v1568_v19 = vmul.f32 -1.442695, %v708_v17  ;;  %v709_v20 = vadd.f32 %v695_v15, %v684_v18  ;;  %v685_v29 = vadd.f32 %v678_v21, %v475_v27  ;;  %v2302_v15 = vmov (%p461_p2), 1  }
 0x238   : > { %v680_v25 = vpop.f32.mrf.mxu1 }
 0x239   : > { %1760 = vpow2.f32 %v1568_v19  ;;  %v1569_v23 = vmul.f32 -1.442695, %v709_v20  ;;  %v686_v28 = vadd.f32 %v680_v25, %v476_v24  ;;  %v710_v32 = vadd.f32 %v699_v30, %v685_v29 }
 0x23b   : > { %1762 = vpow2.f32 %v1569_v23  ;;  %v711_v31 = vadd.f32 %v703_v0, %v686_v28 }
 0x23c   : > { %1764 = vtanh.f32 %v710_v32 }
 0x23d   : > { %v1570_v33 = vmul.f32 -1.442695, %v711_v31 }
 0x23f   : > { %1766 = vpow2.f32 %v1570_v33 }
 0x246   : > { %v1761_v34 = vpop.eup %1760 }
 0x247   : > { %v715_v35 = vadd.f32 1.0, %v1761_v34 }
 0x248   : > { %v1763_v36 = vpop.eup %1762 }
 0x249   : > { %1768 = vrcp.f32 %v715_v35  ;;  %v721_v37 = vadd.f32 1.0, %v1763_v36  ;;  %v1765_v38 = vpop.eup %1764 }
 0x24b   : > { %1770 = vrcp.f32 %v721_v37 }
 0x24c   : > { %v1767_v39 = vpop.eup %1766 }
 0x24d   : > { %v728_v43 = vadd.f32 1.0, %v1767_v39 }
 0x24f   : > { %1772 = vrcp.f32 %v728_v43 }
 0x256   : > { %v1769_v40 = vpop.eup %1768 }
 0x257   : > { %v732_v45 = vmul.f32 %v1769_v40, %v1765_v38 }
 0x258   : > { %v1771_v42 = vpop.eup %1770 }
 0x259   : > { %v731_v44 = vmul.f32 %v2028_v51, %v1771_v42 }
 0x25b   : > { %v733_v46 = vadd.f32 %v732_v45, %v731_v44 }
 0x25c   : > { %v1773_v48 = vpop.eup %1772 }
 0x25d   : > { %1774 = vtanh.f32 %v733_v46  ;;  %v747_v47 = vsel %vm742_vm1, %v733_v46, %v2028_v51  }
 0x25e   : > { %v2493_v51 = vmov %v747_v47 }
 0x26a   : > { %v1775_v49 = vpop.eup %1774  ;;  %463 = sbr.rel (!%p461_p2) target bundleno = 337 (0x151), region = 112 }
 0x26b   : > { %v735_v50 = vmul.f32 %v1775_v49, %v1773_v48 }
 0x26d   : > { %v743_v53 = vsel %vm742_vm1, %v735_v50, 0.0  ;;  %v746_v54 = vsel %vm742_vm1, %v735_v50, %v2032_v52  }
 0x26e   : > { %745 = vst [vmem:[%s744_s22] sm:$0xff] %v743_v53  ;;  %v2494_v52 = vmov %v746_v54 }
 0x26f   :  { %v751_v52 = vsel %vm750_vm2, %v2188_v1, 2147483648 }
 0x270   :  { %v752_v56 = vrot.slane %v751_v52, 4 }
 0x272   :  { %vm753_vm3 = vcmp.gt.s32.totalorder %v751_v52, %v752_v56 }
 0x273   :  { %v754_v57 = vsel %vm753_vm3, %v751_v52, %v752_v56 }
 0x274   :  { %v755_v58 = vrot.slane %v754_v57, 2 }
 0x276   :  { %vm756_vm4 = vcmp.gt.s32.totalorder %v754_v57, %v755_v58 }
 0x277   :  { %v757_v59 = vsel %vm756_vm4, %v754_v57, %v755_v58 }
 0x278   :  { %v758_v60 = vrot.slane %v757_v59, 1 }
 0x27a   :  { %vm759_vm5 = vcmp.gt.s32.totalorder %v757_v59, %v758_v60 }
 0x27b   :  { %v760_v61 = vsel %vm759_vm5, %v757_v59, %v758_v60 }
 0x27c   :  { %vm761_vm6 = vcmp.gt.s32.totalorder %v760_v61, 0  ;;  %vm762_vm7 = vcmp.gt.s32.totalorder %v760_v61, 1  ;;  %vm763_vm8 = vcmp.gt.s32.totalorder %v760_v61, 2  ;;  %vm764_vm9 = vcmp.gt.s32.totalorder %v760_v61, 3 }
 0x27d   :  { %vm765_vm10 = vcmp.gt.s32.totalorder %v760_v61, 4  ;;  %vm766_vm11 = vcmp.gt.s32.totalorder %v760_v61, 5  ;;  %vm767_vm12 = vcmp.gt.s32.totalorder %v760_v61, 6  ;;  %vm768_vm13 = vcmp.gt.s32.totalorder %v760_v61, 7 }
 0x27e   :  { %v2282_v51 = vsel %vm761_vm6, 0.0, %v2075_v2  ;;  %v2284_v1 = vsel %vm762_vm7, 0.0, %v2075_v2  ;;  %v2286_v62 = vsel %vm763_vm8, 0.0, %v2075_v2  ;;  %v2288_v63 = vsel %vm764_vm9, 0.0, %v2075_v2 }
 0x27f   :  { %v2290_v6 = vsel %vm765_vm10, 0.0, %v2075_v2  ;;  %v2292_v10 = vsel %vm766_vm11, 0.0, %v2075_v2  ;;  %v2294_v11 = vsel %vm767_vm12, 0.0, %v2075_v2  ;;  %v2296_v12 = vsel %vm768_vm13, 0.0, %v2075_v2 }
 0x280 LB: > { %v852_v16 = vld [vmem:[#allocation10 + $0x1e8] sm:$0xff]  ;;  %v851_v17 = vld [vmem:[#allocation10 + $0x1e0] sm:$0xff]  ;;  %1004 = vmatprep.mubr.f32.mxu0 %v2056_v54  ;;  %1075 = vmatprep.mubr.f32.mxu1 %v2056_v54  ;;  %v854_v25 = vld [vmem:[#allocation10 + $0x1f8] sm:$0xff]  ;;  %vm788_vm14 = vcmp.eq.s32.totalorder %v2278_v55, %v2048_v15  ;;  %v935_v15 = vrot.slane %v2198_v3, %v702_v22  ;;  %vm2079_vm15 = vmmov 0   ;;  %s2060_s5 = sphi %s2308_s5, %s782_s5   ;;  %v2056_v54 = vphi %v746_v54, %v2354_v54   ;;  %v2052_v47 = vphi %v747_v47, %v2347_v47   ;;  %v2048_v15 = vphi %v2302_v15, %v1490_v15   ;;  %v2044_v14 = vphi %v2300_v14, %v2496_v14   ;;  %v2040_v13 = vphi %v2298_v13, %v2495_v13  }
 0x281   : > { %v848_v18 = vld [vmem:[#allocation10 + $0x1c8] sm:$0xff]  ;;  %940 = vmatprep.subr.mxu0 %v852_v16  ;;  %v847_v19 = vld [vmem:[#allocation10 + $0x1c0] sm:$0xff]  ;;  %1011 = vmatprep.subr.mxu1 %v854_v25  ;;  %v853_v28 = vld [vmem:[#allocation10 + $0x1f0] sm:$0xff] }
 0x282   : > { %941 = vmatpush1.msra.mxu0 %v851_v17  ;;  %v844_v20 = vld [vmem:[#allocation10 + $0x1a8] sm:$0xff]  ;;  %v843_v21 = vld [vmem:[#allocation10 + $0x1a0] sm:$0xff]  ;;  %1012 = vmatpush1.msra.mxu1 %v853_v28  ;;  %v850_v29 = vld [vmem:[#allocation10 + $0x1d8] sm:$0xff] }
 0x283   : > { %942 = vmatprep.subr.mxu0 %v848_v18  ;;  %v840_v23 = vld [vmem:[#allocation10 + $0x188] sm:$0xff]  ;;  %v839_v24 = vld [vmem:[#allocation10 + $0x180] sm:$0xff]  ;;  %v849_v30 = vld [vmem:[#allocation10 + $0x1d0] sm:$0xff]  ;;  %1013 = vmatprep.subr.mxu1 %v850_v29 }
 0x284   : > { %943 = vmatpush1.msra.mxu0 %v847_v19  ;;  %v836_v27 = vld [vmem:[#allocation10 + $0x168] sm:$0xff]  ;;  %v835_v0 = vld [vmem:[#allocation10 + $0x160] sm:$0xff]  ;;  %v846_v32 = vld [vmem:[#allocation10 + $0x1b8] sm:$0xff]  ;;  %1014 = vmatpush1.msra.mxu1 %v849_v30 }
 0x285   : > { %944 = vmatprep.subr.mxu0 %v844_v20  ;;  %v832_v31 = vld [vmem:[#allocation10 + $0x148] sm:$0xff]  ;;  %v831_v33 = vld [vmem:[#allocation10 + $0x140] sm:$0xff]  ;;  %v845_v34 = vld [vmem:[#allocation10 + $0x1b0] sm:$0xff]  ;;  %1015 = vmatprep.subr.mxu1 %v846_v32 }
 0x286   : > { %945 = vmatpush1.msra.mxu0 %v843_v21  ;;  %v842_v35 = vld [vmem:[#allocation10 + $0x198] sm:$0xff]  ;;  %v828_v36 = vld [vmem:[#allocation10 + $0x128] sm:$0xff]  ;;  %v841_v37 = vld [vmem:[#allocation10 + $0x190] sm:$0xff]  ;;  %1016 = vmatpush1.msra.mxu1 %v845_v34 }
 0x287   : > { %946 = vmatprep.subr.mxu0 %v840_v23  ;;  %v827_v38 = vld [vmem:[#allocation10 + $0x120] sm:$0xff]  ;;  %v838_v39 = vld [vmem:[#allocation10 + $0x178] sm:$0xff]  ;;  %v824_v40 = vld [vmem:[#allocation10 + $0x108] sm:$0xff]  ;;  %1017 = vmatprep.subr.mxu1 %v842_v35 }
 0x288   : > { %947 = vmatpush1.msra.mxu0 %v839_v24  ;;  %v837_v41 = vld [vmem:[#allocation10 + $0x170] sm:$0xff]  ;;  %v823_v42 = vld [vmem:[#allocation10 + $0x100] sm:$0xff]  ;;  %1018 = vmatpush1.msra.mxu1 %v841_v37  ;;  %v834_v43 = vld [vmem:[#allocation10 + $0x158] sm:$0xff] }
 0x289   : > { %948 = vmatprep.subr.mxu0 %v836_v27  ;;  %v820_v44 = vld [vmem:[#allocation10 + $0xe8] sm:$0xff]  ;;  %1019 = vmatprep.subr.mxu1 %v838_v39  ;;  %v833_v45 = vld [vmem:[#allocation10 + $0x150] sm:$0xff]  ;;  %v819_v46 = vld [vmem:[#allocation10 + $0xe0] sm:$0xff] }
 0x28a   : > { %949 = vmatpush1.msra.mxu0 %v835_v0  ;;  %1020 = vmatpush1.msra.mxu1 %v837_v41  ;;  %v830_v48 = vld [vmem:[#allocation10 + $0x138] sm:$0xff]  ;;  %v816_v49 = vld [vmem:[#allocation10 + $0xc8] sm:$0xff]  ;;  %v829_v50 = vld [vmem:[#allocation10 + $0x130] sm:$0xff] }
 0x28b   : > { %950 = vmatprep.subr.mxu0 %v832_v31  ;;  %1021 = vmatprep.subr.mxu1 %v834_v43  ;;  %v815_v53 = vld [vmem:[#allocation10 + $0xc0] sm:$0xff]  ;;  %v826_v54 = vld [vmem:[#allocation10 + $0x118] sm:$0xff]  ;;  %v812_v52 = vld [vmem:[#allocation10 + $0xa8] sm:$0xff] }
 0x28c   : > { %951 = vmatpush1.msra.mxu0 %v831_v33  ;;  %1022 = vmatpush1.msra.mxu1 %v833_v45  ;;  %v825_v56 = vld [vmem:[#allocation10 + $0x110] sm:$0xff]  ;;  %v811_v57 = vld [vmem:[#allocation10 + $0xa0] sm:$0xff]  ;;  %v822_v58 = vld [vmem:[#allocation10 + $0xf8] sm:$0xff] }
 0x28d   : > { %952 = vmatprep.subr.mxu0 %v828_v36  ;;  %1023 = vmatprep.subr.mxu1 %v830_v48  ;;  %v808_v59 = vld [vmem:[#allocation10 + $0x88] sm:$0xff]  ;;  %v821_v60 = vld [vmem:[#allocation10 + $0xf0] sm:$0xff]  ;;  %v807_v61 = vld [vmem:[#allocation10 + $0x80] sm:$0xff] }
 0x28e   : > { %953 = vmatpush1.msra.mxu0 %v827_v38  ;;  %1024 = vmatpush1.msra.mxu1 %v829_v50  ;;  %v818_v2 = vld [vmem:[#allocation10 + $0xd8] sm:$0xff]  ;;  %v804_v16 = vld [vmem:[#allocation10 + $0x68] sm:$0xff]  ;;  %v817_v17 = vld [vmem:[#allocation10 + $0xd0] sm:$0xff] }
 0x28f   : > { %954 = vmatprep.subr.mxu0 %v824_v40  ;;  %1025 = vmatprep.subr.mxu1 %v826_v54  ;;  %v803_v18 = vld [vmem:[#allocation10 + $0x60] sm:$0xff]  ;;  %v814_v19 = vld [vmem:[#allocation10 + $0xb8] sm:$0xff]  ;;  %v800_v20 = vld [vmem:[#allocation10 + $0x48] sm:$0xff] }
 0x290   : > { %955 = vmatpush1.msra.mxu0 %v823_v42  ;;  %1026 = vmatpush1.msra.mxu1 %v825_v56  ;;  %v813_v21 = vld [vmem:[#allocation10 + $0xb0] sm:$0xff]  ;;  %v799_v23 = vld [vmem:[#allocation10 + $0x40] sm:$0xff]  ;;  %v810_v24 = vld [vmem:[#allocation10 + $0x98] sm:$0xff] }
 0x291   : > { %956 = vmatprep.subr.mxu0 %v820_v44  ;;  %1027 = vmatprep.subr.mxu1 %v822_v58  ;;  %v796_v25 = vld [vmem:[#allocation10 + $0x28] sm:$0xff]  ;;  %v809_v27 = vld [vmem:[#allocation10 + $0x90] sm:$0xff]  ;;  %v795_v28 = vld [vmem:[#allocation10 + $0x20] sm:$0xff] }
 0x292   : > { %957 = vmatpush1.msra.mxu0 %v819_v46  ;;  %1028 = vmatpush1.msra.mxu1 %v821_v60  ;;  %v806_v0 = vld [vmem:[#allocation10 + $0x78] sm:$0xff]  ;;  %v792_v29 = vld [vmem:[#allocation10 + $0x8] sm:$0xff]  ;;  %v805_v30 = vld [vmem:[#allocation10 + $0x70] sm:$0xff] }
 0x293   : > { %958 = vmatprep.subr.mxu0 %v816_v49  ;;  %1029 = vmatprep.subr.mxu1 %v818_v2  ;;  %v791_v31 = vld [vmem:[#allocation10] sm:$0xff]  ;;  %v802_v32 = vld [vmem:[#allocation10 + $0x58] sm:$0xff]  ;;  %v916_v33 = vld [vmem:[#allocation10 + $0x3e8] sm:$0xff] }
 0x294   : > { %959 = vmatpush1.msra.mxu0 %v815_v53  ;;  %1030 = vmatpush1.msra.mxu1 %v817_v17  ;;  %v801_v34 = vld [vmem:[#allocation10 + $0x50] sm:$0xff]  ;;  %v915_v35 = vld [vmem:[#allocation10 + $0x3e0] sm:$0xff]  ;;  %v798_v36 = vld [vmem:[#allocation10 + $0x38] sm:$0xff] }
 0x295   : > { %960 = vmatprep.subr.mxu0 %v812_v52  ;;  %1031 = vmatprep.subr.mxu1 %v814_v19  ;;  %v912_v37 = vld [vmem:[#allocation10 + $0x3c8] sm:$0xff]  ;;  %v797_v38 = vld [vmem:[#allocation10 + $0x30] sm:$0xff]  ;;  %v911_v39 = vld [vmem:[#allocation10 + $0x3c0] sm:$0xff] }
 0x296   : > { %961 = vmatpush1.msra.mxu0 %v811_v57  ;;  %1032 = vmatpush1.msra.mxu1 %v813_v21  ;;  %v794_v40 = vld [vmem:[#allocation10 + $0x18] sm:$0xff]  ;;  %v908_v41 = vld [vmem:[#allocation10 + $0x3a8] sm:$0xff]  ;;  %v793_v42 = vld [vmem:[#allocation10 + $0x10] sm:$0xff] }
 0x297   : > { %962 = vmatprep.subr.mxu0 %v808_v59  ;;  %1033 = vmatprep.subr.mxu1 %v810_v24  ;;  %v907_v43 = vld [vmem:[#allocation10 + $0x3a0] sm:$0xff]  ;;  %v918_v44 = vld [vmem:[#allocation10 + $0x3f8] sm:$0xff]  ;;  %v904_v45 = vld [vmem:[#allocation10 + $0x388] sm:$0xff] }
 0x298   : > { %963 = vmatpush1.msra.mxu0 %v807_v61  ;;  %1034 = vmatpush1.msra.mxu1 %v809_v27  ;;  %v917_v46 = vld [vmem:[#allocation10 + $0x3f0] sm:$0xff]  ;;  %v903_v48 = vld [vmem:[#allocation10 + $0x380] sm:$0xff]  ;;  %v914_v49 = vld [vmem:[#allocation10 + $0x3d8] sm:$0xff] }
 0x299   : > { %964 = vmatprep.subr.mxu0 %v804_v16  ;;  %1035 = vmatprep.subr.mxu1 %v806_v0  ;;  %v900_v50 = vld [vmem:[#allocation10 + $0x368] sm:$0xff]  ;;  %v913_v53 = vld [vmem:[#allocation10 + $0x3d0] sm:$0xff]  ;;  %v899_v54 = vld [vmem:[#allocation10 + $0x360] sm:$0xff] }
 0x29a   : > { %965 = vmatpush1.msra.mxu0 %v803_v18  ;;  %1036 = vmatpush1.msra.mxu1 %v805_v30  ;;  %v910_v52 = vld [vmem:[#allocation10 + $0x3b8] sm:$0xff]  ;;  %v896_v56 = vld [vmem:[#allocation10 + $0x348] sm:$0xff]  ;;  %v909_v57 = vld [vmem:[#allocation10 + $0x3b0] sm:$0xff] }
 0x29b   : > { %966 = vmatprep.subr.mxu0 %v800_v20  ;;  %1037 = vmatprep.subr.mxu1 %v802_v32  ;;  %v895_v58 = vld [vmem:[#allocation10 + $0x340] sm:$0xff]  ;;  %v906_v59 = vld [vmem:[#allocation10 + $0x398] sm:$0xff]  ;;  %v892_v60 = vld [vmem:[#allocation10 + $0x328] sm:$0xff] }
 0x29c   : > { %967 = vmatpush1.msra.mxu0 %v799_v23  ;;  %1038 = vmatpush1.msra.mxu1 %v801_v34  ;;  %v905_v61 = vld [vmem:[#allocation10 + $0x390] sm:$0xff]  ;;  %v891_v2 = vld [vmem:[#allocation10 + $0x320] sm:$0xff]  ;;  %v902_v16 = vld [vmem:[#allocation10 + $0x378] sm:$0xff] }
 0x29d   : > { %968 = vmatprep.subr.mxu0 %v796_v25  ;;  %1039 = vmatprep.subr.mxu1 %v798_v36  ;;  %v888_v17 = vld [vmem:[#allocation10 + $0x308] sm:$0xff]  ;;  %v901_v18 = vld [vmem:[#allocation10 + $0x370] sm:$0xff]  ;;  %v887_v19 = vld [vmem:[#allocation10 + $0x300] sm:$0xff] }
 0x29e   : > { %969 = vmatpush1.msra.mxu0 %v795_v28  ;;  %1040 = vmatpush1.msra.mxu1 %v797_v38  ;;  %v898_v20 = vld [vmem:[#allocation10 + $0x358] sm:$0xff]  ;;  %v884_v21 = vld [vmem:[#allocation10 + $0x2e8] sm:$0xff]  ;;  %v897_v23 = vld [vmem:[#allocation10 + $0x350] sm:$0xff] }
 0x29f   : > { %970 = vmatprep.subr.mxu0 %v792_v29  ;;  %1041 = vmatprep.subr.mxu1 %v794_v40  ;;  %v883_v24 = vld [vmem:[#allocation10 + $0x2e0] sm:$0xff]  ;;  %v894_v25 = vld [vmem:[#allocation10 + $0x338] sm:$0xff]  ;;  %v880_v27 = vld [vmem:[#allocation10 + $0x2c8] sm:$0xff] }
 0x2a0   : > { %971 = vmatpush1.msra.mxu0 %v791_v31  ;;  %1042 = vmatpush1.msra.mxu1 %v793_v42  ;;  %v893_v28 = vld [vmem:[#allocation10 + $0x330] sm:$0xff]  ;;  %v879_v0 = vld [vmem:[#allocation10 + $0x2c0] sm:$0xff]  ;;  %v890_v29 = vld [vmem:[#allocation10 + $0x318] sm:$0xff] }
 0x2a1   : > { %972 = vmatprep.subr.mxu0 %v916_v33  ;;  %1043 = vmatprep.subr.mxu1 %v918_v44  ;;  %v876_v30 = vld [vmem:[#allocation10 + $0x2a8] sm:$0xff]  ;;  %v889_v31 = vld [vmem:[#allocation10 + $0x310] sm:$0xff]  ;;  %v875_v32 = vld [vmem:[#allocation10 + $0x2a0] sm:$0xff] }
 0x2a2   : > { %973 = vmatpush2.msra.mxu0 %v915_v35  ;;  %1044 = vmatpush2.msra.mxu1 %v917_v46  ;;  %v886_v33 = vld [vmem:[#allocation10 + $0x2f8] sm:$0xff]  ;;  %v872_v34 = vld [vmem:[#allocation10 + $0x288] sm:$0xff]  ;;  %v885_v35 = vld [vmem:[#allocation10 + $0x2f0] sm:$0xff] }
 0x2a3   : > { %974 = vmatprep.subr.mxu0 %v912_v37  ;;  %1045 = vmatprep.subr.mxu1 %v914_v49  ;;  %v871_v36 = vld [vmem:[#allocation10 + $0x280] sm:$0xff]  ;;  %v882_v37 = vld [vmem:[#allocation10 + $0x2d8] sm:$0xff]  ;;  %v868_v38 = vld [vmem:[#allocation10 + $0x268] sm:$0xff] }
 0x2a4   : > { %975 = vmatpush2.msra.mxu0 %v911_v39  ;;  %1046 = vmatpush2.msra.mxu1 %v913_v53  ;;  %v881_v39 = vld [vmem:[#allocation10 + $0x2d0] sm:$0xff]  ;;  %v867_v40 = vld [vmem:[#allocation10 + $0x260] sm:$0xff]  ;;  %v864_v42 = vld [vmem:[#allocation10 + $0x248] sm:$0xff] }
 0x2a5   : > { %976 = vmatprep.subr.mxu0 %v908_v41  ;;  %1047 = vmatprep.subr.mxu1 %v910_v52  ;;  %v878_v41 = vld [vmem:[#allocation10 + $0x2b8] sm:$0xff]  ;;  %v863_v44 = vld [vmem:[#allocation10 + $0x240] sm:$0xff]  ;;  %v860_v46 = vld [vmem:[#allocation10 + $0x228] sm:$0xff] }
 0x2a6   : > { %977 = vmatpush2.msra.mxu0 %v907_v43  ;;  %1048 = vmatpush2.msra.mxu1 %v909_v57  ;;  %v877_v43 = vld [vmem:[#allocation10 + $0x2b0] sm:$0xff]  ;;  %v859_v49 = vld [vmem:[#allocation10 + $0x220] sm:$0xff]  ;;  %v856_v53 = vld [vmem:[#allocation10 + $0x208] sm:$0xff] }
 0x2a7   : > { %978 = vmatprep.subr.mxu0 %v904_v45  ;;  %1049 = vmatprep.subr.mxu1 %v906_v59  ;;  %v874_v45 = vld [vmem:[#allocation10 + $0x298] sm:$0xff]  ;;  %v855_v52 = vld [vmem:[#allocation10 + $0x200] sm:$0xff]  ;;  %v865_v57 = vld [vmem:[#allocation10 + $0x250] sm:$0xff] }
 0x2a8   : > { %979 = vmatpush2.msra.mxu0 %v903_v48  ;;  %1050 = vmatpush2.msra.mxu1 %v905_v61  ;;  %v873_v48 = vld [vmem:[#allocation10 + $0x290] sm:$0xff]  ;;  %v858_v61 = vld [vmem:[#allocation10 + $0x218] sm:$0xff] }
 0x2a9   : > { %980 = vmatprep.subr.mxu0 %v900_v50  ;;  %1051 = vmatprep.subr.mxu1 %v902_v16  ;;  %v870_v50 = vld [vmem:[#allocation10 + $0x278] sm:$0xff]  ;;  %v861_v59 = vld [vmem:[#allocation10 + $0x230] sm:$0xff]  ;;  %v923_v16 = vrot.slane %v2198_v3, %v690_v8 }
 0x2aa   : > { %981 = vmatpush2.msra.mxu0 %v899_v54  ;;  %1052 = vmatpush2.msra.mxu1 %v901_v18  ;;  %v869_v54 = vld [vmem:[#allocation10 + $0x270] sm:$0xff] }
 0x2ab   : > { %982 = vmatprep.subr.mxu0 %v896_v56  ;;  %1053 = vmatprep.subr.mxu1 %v898_v20  ;;  %v866_v56 = vld [vmem:[#allocation10 + $0x258] sm:$0xff] }
 0x2ac   : > { %983 = vmatpush2.msra.mxu0 %v895_v58  ;;  %1054 = vmatpush2.msra.mxu1 %v897_v23  ;;  %v862_v58 = vld [vmem:[#allocation10 + $0x238] sm:$0xff] }
 0x2ad   : > { %984 = vmatprep.subr.mxu0 %v892_v60  ;;  %1055 = vmatprep.subr.mxu1 %v894_v25  ;;  %v2076_v60 = vmov 1.0  }
 0x2ae   : > { %985 = vmatpush2.msra.mxu0 %v891_v2  ;;  %1056 = vmatpush2.msra.mxu1 %v893_v28  ;;  %v857_v2 = vld [vmem:[#allocation10 + $0x210] sm:$0xff]  ;;  %v931_v28 = vrot.slane %v2198_v3, %v698_v26 }
 0x2af   : > { %986 = vmatprep.subr.mxu0 %v888_v17  ;;  %1057 = vmatprep.subr.mxu1 %v890_v29  ;;  %v927_v17 = vrot.slane %v2198_v3, %v694_v9 }
 0x2b0   : > { %987 = vmatpush2.msra.mxu0 %v887_v19  ;;  %1058 = vmatpush2.msra.mxu1 %v889_v31 }
 0x2b1   : > { %988 = vmatprep.subr.mxu0 %v884_v21  ;;  %1059 = vmatprep.subr.mxu1 %v886_v33 }
 0x2b2   : > { %989 = vmatpush2.msra.mxu0 %v883_v24  ;;  %1060 = vmatpush2.msra.mxu1 %v885_v35 }
 0x2b3   : > { %990 = vmatprep.subr.mxu0 %v880_v27  ;;  %1061 = vmatprep.subr.mxu1 %v882_v37 }
 0x2b4   : > { %991 = vmatpush2.msra.mxu0 %v879_v0  ;;  %1062 = vmatpush2.msra.mxu1 %v881_v39 }
 0x2b5   : > { %992 = vmatprep.subr.mxu0 %v876_v30  ;;  %1063 = vmatprep.subr.mxu1 %v878_v41 }
 0x2b6   : > { %993 = vmatpush2.msra.mxu0 %v875_v32  ;;  %1064 = vmatpush2.msra.mxu1 %v877_v43 }
 0x2b7   : > { %994 = vmatprep.subr.mxu0 %v872_v34  ;;  %1065 = vmatprep.subr.mxu1 %v874_v45  ;;  %v2352_v45 = vld [vmem:[#allocation3] sm:$0xff] }
 0x2b8   : > { %995 = vmatpush2.msra.mxu0 %v871_v36  ;;  %1066 = vmatpush2.msra.mxu1 %v873_v48 }
 0x2b9   : > { %996 = vmatprep.subr.mxu0 %v868_v38  ;;  %1067 = vmatprep.subr.mxu1 %v870_v50  ;;  %v2363_v50 = vld [vmem:[#allocation3 + $0x8] sm:$0xff] }
 0x2ba   : > { %997 = vmatpush2.msra.mxu0 %v867_v40  ;;  %1068 = vmatpush2.msra.mxu1 %v869_v54 }
 0x2bb   : > { %998 = vmatprep.subr.mxu0 %v864_v42  ;;  %1069 = vmatprep.subr.mxu1 %v866_v56  ;;  %v2369_v56 = vld [vmem:[#allocation3 + $0x28] sm:$0xff] }
 0x2bc   : > { %999 = vmatpush2.msra.mxu0 %v863_v44  ;;  %1070 = vmatpush2.msra.mxu1 %v865_v57  ;;  %v2350_v44 = vld [vmem:[#allocation3 + $0x10] sm:$0xff]  ;;  %v2371_v57 = vld [vmem:[#allocation3 + $0x20] sm:$0xff] }
 0x2bd   : > { %1000 = vmatprep.subr.mxu0 %v860_v46  ;;  %1071 = vmatprep.subr.mxu1 %v862_v58 }
 0x2be   : > { %1001 = vmatpush2.msra.mxu0 %v859_v49  ;;  %1072 = vmatpush2.msra.mxu1 %v861_v59  ;;  %v2361_v49 = vld [vmem:[#allocation3 + $0x18] sm:$0xff] }
 0x2bf   : > { %1002 = vmatprep.subr.mxu0 %v856_v53  ;;  %1073 = vmatprep.subr.mxu1 %v858_v61  ;;  %v2379_v61 = vld [vmem:[#allocation3 + $0x30] sm:$0xff] }
 0x2c0   : > { %1003 = vmatpush2.msra.mxu0 %v855_v52  ;;  %1074 = vmatpush2.msra.mxu1 %v857_v2 }
 0x2c1   : > { %1572 = vmatmul.mubr.msk.f32.vlgmr.msra.gmra.mxu0 %vm788_vm14, %v2076_v60  ;;  %1573 = vmatmul.mubr.msk.f32.vlgmr.msra.gmra.mxu1 %vm788_vm14, %v2076_v60  ;;  %v2377_v60 = vld [vmem:[#allocation3 + $0x38] sm:$0xff] }
 0x381   : > { %v1006_v18 = vpop.f32.mrf.mxu0  ;;  %v1077_v25 = vpop.f32.mrf.mxu1 }
 0x382   : > { %v1007_v19 = vadd.f32 %v1006_v18, %v923_v16  ;;  %v1078_v29 = vadd.f32 %v1077_v25, %v931_v28  ;;  %v1295_v18 = vld [vmem:[#allocation12 + $0xf8] sm:$0xff] }
 0x383   : > { %v1008_v20 = vpop.f32.mrf.mxu0  ;;  %v1079_v27 = vpop.f32.mrf.mxu1  ;;  %1580 = vmatprep.subr.mxu0 %v1295_v18 }
 0x384   : > { %v1574_v21 = vmul.f32 -1.442695, %v1007_v19  ;;  %v1009_v23 = vadd.f32 %v1008_v20, %v927_v17  ;;  %v1080_v0 = vadd.f32 %v1079_v27, %v935_v15  ;;  %v2077_v17 = vmov 0   ;;  %v1279_v19 = vld [vmem:[#allocation12 + $0x78] sm:$0xff]  ;;  %v1294_v20 = vld [vmem:[#allocation12 + $0xf0] sm:$0xff] }
 0x385   : > { %1777 = vset.pattern.permute.xlu1 %v2077_v17  ;;  %1776 = vset.pattern.permute.xlu0 %v2077_v17 }
 0x386   : > { %1778 = vpow2.f32 %v1574_v21  ;;  %v1575_v24 = vmul.f32 -1.442695, %v1009_v23  ;;  %v1576_v30 = vmul.f32 -1.442695, %v1080_v0  ;;  %v1278_v21 = vld [vmem:[#allocation12 + $0x70] sm:$0xff]  ;;  %1581 = vmatpush3.msra.mxu0 %v1279_v19 }
 0x387   : > { %1582 = vmatprep.subr.mxu0 %v1294_v20 }
 0x388   : > { %1780 = vpow2.f32 %v1575_v24  ;;  %1583 = vmatpush3.msra.mxu0 %v1278_v21 }
 0x389   : > { %1782 = vtanh.f32 %v1078_v29 }
 0x38a   : > { %1784 = vpow2.f32 %v1576_v30 }
 0x393   : > { %v1779_v31 = vpop.eup %1778 }
 0x394   : > { %v1085_v32 = vadd.f32 1.0, %v1779_v31 }
 0x395   : > { %v1781_v33 = vpop.eup %1780 }
 0x396   : > { %1786 = vrcp.f32 %v1085_v32  ;;  %v1091_v34 = vadd.f32 1.0, %v1781_v33  ;;  %v1783_v35 = vpop.eup %1782 }
 0x397   : > { %v1785_v36 = vpop.eup %1784 }
 0x398   : > { %1788 = vrcp.f32 %v1091_v34  ;;  %v1098_v39 = vadd.f32 1.0, %v1785_v36 }
 0x39a   : > { %1790 = vrcp.f32 %v1098_v39 }
 0x3a3   : > { %v1787_v37 = vpop.eup %1786 }
 0x3a4   : > { %v1102_v41 = vmul.f32 %v1787_v37, %v1783_v35 }
 0x3a5   : > { %v1789_v38 = vpop.eup %1788 }
 0x3a6   : > { %v1101_v40 = vmul.f32 %v2052_v47, %v1789_v38 }
 0x3a7   : > { %v1791_v42 = vpop.eup %1790 }
 0x3a8   : > { %v2347_v47 = vadd.f32 %v1102_v41, %v1101_v40  }
 0x3aa   : > { %1792 = vtanh.f32 %v2347_v47 }
 0x3b7   : > { %v1793_v43 = vpop.eup %1792 }
 0x3b8   : > { %v2354_v54 = vmul.f32 %v1793_v43, %v1791_v42  }
 0x3ba   : > { %1366 = vmatprep.mubr.f32.mxu0 %v2354_v54  ;;  %v1116_v46 = vmul.f32 %v2350_v44, %v2354_v54  ;;  %v1114_v48 = vmul.f32 %v2352_v45, %v2354_v54  ;;  %v1117_v53 = vmul.f32 %v2361_v49, %v2354_v54  ;;  %v1115_v52 = vmul.f32 %v2363_v50, %v2354_v54 }
 0x3bb   : > { %v1119_v58 = vmul.f32 %v2369_v56, %v2354_v54  ;;  %v1118_v59 = vmul.f32 %v2371_v57, %v2354_v54  ;;  %v1121_v2 = vmul.f32 %v2377_v60, %v2354_v54  ;;  %v1120_v16 = vmul.f32 %v2379_v61, %v2354_v54 }
 0x3bc   : > { %1126 = vadd.xlane.f32.xlu1 %v1116_v46  ;;  %1122 = vadd.xlane.f32.xlu0 %v1114_v48 }
 0x3c0   : > { %1128 = vadd.xlane.f32.xlu1 %v1117_v53  ;;  %1124 = vadd.xlane.f32.xlu0 %v1115_v52 }
 0x3c4   : > { %1132 = vadd.xlane.f32.xlu1 %v1119_v58  ;;  %1130 = vadd.xlane.f32.xlu0 %v1118_v59 }
 0x3c8   : > { %1136 = vadd.xlane.f32.xlu1 %v1121_v2  ;;  %1134 = vadd.xlane.f32.xlu0 %v1120_v16 }
 0x445   : > { %v1127_v23 = vpop.xlane.xlu1 %1126  ;;  %v1123_v24 = vpop.xlane.xlu0 %1122 }
 0x446   : > { %v1138_v0 = vadd.f32 %v1123_v24, %v2282_v51  ;;  %v1140_v32 = vadd.f32 %v1127_v23, %v2286_v62 }
 0x448   : > { %v1146_v38 = vsel %vm750_vm2, %v1138_v0, -inf  ;;  %v1148_v46 = vsel %vm750_vm2, %v1140_v32, -inf }
 0x449   : > { %v1129_v25 = vpop.xlane.xlu1 %1128  ;;  %v1125_v15 = vpop.xlane.xlu0 %1124 }
 0x44a   : > { %v1139_v29 = vadd.f32 %v1125_v15, %v2284_v1  ;;  %v1141_v33 = vadd.f32 %v1129_v25, %v2288_v63 }
 0x44c   : > { %v1147_v39 = vsel %vm750_vm2, %v1139_v29, -inf  ;;  %v1149_v48 = vsel %vm750_vm2, %v1141_v33, -inf }
 0x44d   : > { %v1133_v27 = vpop.xlane.xlu1 %1132  ;;  %v1131_v28 = vpop.xlane.xlu0 %1130 }
 0x44e   : > { %v1143_v30 = vadd.f32 %v1133_v27, %v2292_v10  ;;  %v1142_v31 = vadd.f32 %v1131_v28, %v2290_v6 }
 0x450   : > { %v1152_v34 = vsel %vm750_vm2, %v1143_v30, -inf  ;;  %v1150_v35 = vsel %vm750_vm2, %v1142_v31, -inf }
 0x451   : > { %v1137_v36 = vpop.xlane.xlu1 %1136  ;;  %v1135_v37 = vpop.xlane.xlu0 %1134  ;;  %v1153_v42 = vmax.f32 %v1147_v39, %v1152_v34  ;;  %v1151_v43 = vmax.f32 %v1146_v38, %v1150_v35 }
 0x452   : > { %v1145_v40 = vadd.f32 %v1137_v36, %v2296_v12  ;;  %v1144_v41 = vadd.f32 %v1135_v37, %v2294_v11 }
 0x453   : > { %v1158_v2 = vmax.f32 %v1151_v43, %v1153_v42 }
 0x454   : > { %v1156_v53 = vsel %vm750_vm2, %v1145_v40, -inf  ;;  %v1154_v52 = vsel %vm750_vm2, %v1144_v41, -inf }
 0x455   : > { %v1157_v58 = vmax.f32 %v1149_v48, %v1156_v53  ;;  %v1155_v59 = vmax.f32 %v1148_v46, %v1154_v52 }
 0x457   : > { %v1159_v16 = vmax.f32 %v1155_v59, %v1157_v58 }
 0x459   : > { %v1160_v17 = vmax.f32 %v1158_v2, %v1159_v16 }
 0x45b   : > { %v1161_v18 = vsub.f32 %v1138_v0, %v1160_v17  ;;  %v1163_v19 = vsub.f32 %v1140_v32, %v1160_v17  ;;  %v1162_v21 = vsub.f32 %v1139_v29, %v1160_v17  ;;  %v1164_v23 = vsub.f32 %v1141_v33, %v1160_v17 }
 0x45c   : > { %v1165_v25 = vsub.f32 %v1142_v31, %v1160_v17  ;;  %v1166_v27 = vsub.f32 %v1143_v30, %v1160_v17  ;;  %v1167_v34 = vsub.f32 %v1144_v41, %v1160_v17  ;;  %v1168_v36 = vsub.f32 %v1145_v40, %v1160_v17 }
 0x45d   : > { %v1169_v20 = vmul.f32 1.442695, %v1161_v18  ;;  %v1173_v24 = vmul.f32 1.442695, %v1163_v19  ;;  %v1171_v15 = vmul.f32 1.442695, %v1162_v21 }
 0x45e   : > { %v1175_v28 = vmul.f32 1.442695, %v1164_v23  ;;  %v1177_v35 = vmul.f32 1.442695, %v1165_v25  ;;  %v1179_v37 = vmul.f32 1.442695, %v1166_v27 }
 0x45f   : > { %1794 = vpow2.f32 %v1169_v20  ;;  %v1181_v38 = vmul.f32 1.442695, %v1167_v34  ;;  %v1183_v0 = vmul.f32 1.442695, %v1168_v36  ;;  %v1293_v23 = vld [vmem:[#allocation12 + $0xe8] sm:$0xff]  ;;  %v1276_v34 = vld [vmem:[#allocation12 + $0x60] sm:$0xff] }
 0x460   : > { %1796 = vpow2.f32 %v1173_v24  ;;  %1584 = vmatprep.subr.mxu0 %v1293_v23  ;;  %v1277_v25 = vld [vmem:[#allocation12 + $0x68] sm:$0xff]  ;;  %v1275_v36 = vld [vmem:[#allocation12 + $0x58] sm:$0xff] }
 0x461   : > { %1798 = vpow2.f32 %v1171_v15  ;;  %1585 = vmatpush3.msra.mxu0 %v1277_v25  ;;  %v1281_v23 = vld [vmem:[#allocation12 + $0x88] sm:$0xff] }
 0x462   : > { %1800 = vpow2.f32 %v1175_v28  ;;  %v1292_v28 = vld [vmem:[#allocation12 + $0xe0] sm:$0xff] }
 0x463   : > { %1802 = vpow2.f32 %v1177_v35  ;;  %1586 = vmatprep.subr.mxu0 %v1292_v28  ;;  %v1291_v35 = vld [vmem:[#allocation12 + $0xd8] sm:$0xff] }
 0x464   : > { %1804 = vpow2.f32 %v1179_v37  ;;  %1587 = vmatpush3.msra.mxu0 %v1276_v34  ;;  %v1388_v28 = vld [vmem:[#allocation13 + $0x78] sm:$0xff]  ;;  %v1387_v34 = vld [vmem:[#allocation13 + $0x70] sm:$0xff] }
 0x465   : > { %1806 = vpow2.f32 %v1181_v38  ;;  %1588 = vmatprep.subr.mxu0 %v1291_v35  ;;  %v1290_v38 = vld [vmem:[#allocation12 + $0xd0] sm:$0xff]  ;;  %v1386_v35 = vld [vmem:[#allocation13 + $0x68] sm:$0xff] }
 0x466   : > { %1808 = vpow2.f32 %v1183_v0  ;;  %v1274_v0 = vld [vmem:[#allocation12 + $0x50] sm:$0xff]  ;;  %1589 = vmatpush3.msra.mxu0 %v1275_v36 }
 0x467   : > { %1590 = vmatprep.subr.mxu0 %v1290_v38 }
 0x468   : > { %1591 = vmatpush3.msra.mxu0 %v1274_v0 }
 0x46c   : > { %v1795_v29 = vpop.eup %1794 }
 0x46d   : > { %v1797_v32 = vpop.eup %1796  ;;  %v1185_v31 = vsel %vm750_vm2, %v1795_v29, 0.0 }
 0x46e   : > { %v1799_v33 = vpop.eup %1798  ;;  %v1188_v42 = vsel %vm750_vm2, %v1797_v32, 0.0 }
 0x46f   : > { %v1186_v30 = vsel %vm750_vm2, %v1799_v33, 0.0  ;;  %v1801_v39 = vpop.eup %1800 }
 0x470   : > { %v1187_v41 = vadd.f32 %v1186_v30, %v1185_v31  ;;  %v1803_v40 = vpop.eup %1802  ;;  %v1190_v46 = vsel %vm750_vm2, %v1801_v39, 0.0  ;;  %v1289_v31 = vld [vmem:[#allocation12 + $0xc8] sm:$0xff]  ;;  %v1288_v30 = vld [vmem:[#allocation12 + $0xc0] sm:$0xff] }
 0x471   : > { %v1805_v48 = vpop.eup %1804  ;;  %v1192_v52 = vsel %vm750_vm2, %v1803_v40, 0.0  ;;  %1592 = vmatprep.subr.mxu0 %v1289_v31 }
 0x472   : > { %v1189_v43 = vadd.f32 %v1188_v42, %v1187_v41  ;;  %v2406_v58 = vpop.eup %1806  ;;  %v1194_v2 = vsel %vm750_vm2, %v1805_v48, 0.0  ;;  %v1272_v41 = vld [vmem:[#allocation12 + $0x40] sm:$0xff]  ;;  %v1287_v42 = vld [vmem:[#allocation12 + $0xb8] sm:$0xff] }
 0x473   : > { %v2409_v16 = vpop.eup %1808  ;;  %v1196_v18 = vsel %vm750_vm2, %v2406_v58, 0.0 }
 0x474   : > { %v1191_v53 = vadd.f32 %v1190_v46, %v1189_v43  ;;  %v1198_v20 = vsel %vm750_vm2, %v2409_v16, 0.0  ;;  %v1286_v46 = vld [vmem:[#allocation12 + $0xb0] sm:$0xff] }
 0x476   : > { %v1193_v59 = vadd.f32 %v1192_v52, %v1191_v53  ;;  %v1270_v53 = vld [vmem:[#allocation12 + $0x30] sm:$0xff]  ;;  %v1285_v52 = vld [vmem:[#allocation12 + $0xa8] sm:$0xff] }
 0x478   : > { %v1195_v17 = vadd.f32 %v1194_v2, %v1193_v59  ;;  %v1284_v2 = vld [vmem:[#allocation12 + $0xa0] sm:$0xff] }
 0x47a   : > { %v1197_v19 = vadd.f32 %v1196_v18, %v1195_v17  ;;  %v1268_v17 = vld [vmem:[#allocation12 + $0x20] sm:$0xff]  ;;  %v1283_v18 = vld [vmem:[#allocation12 + $0x98] sm:$0xff] }
 0x47c   : > { %v1199_v21 = vadd.f32 %v1198_v20, %v1197_v19  ;;  %v1282_v20 = vld [vmem:[#allocation12 + $0x90] sm:$0xff] }
 0x47e   : > { %1810 = vrcp.f32 %v1199_v21  ;;  %v1266_v21 = vld [vmem:[#allocation12 + $0x10] sm:$0xff] }
 0x48b   : > { %v2415_v24 = vpop.eup %1810 }
 0x48c   : > { %v1202_v15 = vmul.f32 %v2415_v24, %v1799_v33  ;;  %v1201_v27 = vmul.f32 %v2415_v24, %v1795_v29  ;;  %v1203_v37 = vmul.f32 %v2415_v24, %v1797_v32  ;;  %v1273_v29 = vld [vmem:[#allocation12 + $0x48] sm:$0xff]  ;;  %v1204_v33 = vmul.f32 %v2415_v24, %v1801_v39  ;;  %v1271_v32 = vld [vmem:[#allocation12 + $0x38] sm:$0xff] }
 0x48d   : > { %1593 = vmatpush3.msra.mxu0 %v1273_v29  ;;  %v1205_v43 = vmul.f32 %v2415_v24, %v1803_v40  ;;  %v1269_v39 = vld [vmem:[#allocation12 + $0x28] sm:$0xff]  ;;  %v1206_v59 = vmul.f32 %v2415_v24, %v1805_v48  ;;  %v1267_v40 = vld [vmem:[#allocation12 + $0x18] sm:$0xff]  ;;  %v1207_v19 = vmul.f32 %v2415_v24, %v2406_v58  ;;  %v1208_v25 = vmul.f32 %v2415_v24, %v2409_v16  ;;  %v1385_v16 = vld [vmem:[#allocation13 + $0x60] sm:$0xff] }
 0x48e   : > { %1216 = vperm.xlu1 %1777, %v1202_v15   ;;  %1211 = vperm.xlu0 %1776, %v1201_v27   ;;  %v1265_v48 = vld [vmem:[#allocation12 + $0x8] sm:$0xff]  ;;  %v1280_v15 = vld [vmem:[#allocation12 + $0x80] sm:$0xff]  ;;  %v2078_v58 = vmov 0.0   ;;  %v1384_v24 = vld [vmem:[#allocation13 + $0x58] sm:$0xff] }
 0x48f   : > { %1594 = vmatprep.subr.mxu0 %v1288_v30  ;;  %v1264_v27 = vld [vmem:[#allocation12] sm:$0xff]  ;;  %1632 = vmatprep.subr.mxu1 %v2078_v58 }
 0x490   : > { %1595 = vmatpush3.msra.mxu0 %v1272_v41  ;;  %1633 = vmatpush3.msra.mxu1 %v1388_v28 }
 0x491   : > { %1596 = vmatprep.subr.mxu0 %v1287_v42  ;;  %1634 = vmatprep.subr.mxu1 %v2078_v58 }
 0x492   : > { %1221 = vperm.xlu1 %1777, %v1203_v37   ;;  %1597 = vmatpush3.msra.mxu0 %v1271_v32 }
 0x493   : > { %1598 = vmatprep.subr.mxu0 %v1286_v46  ;;  %1635 = vmatpush3.msra.mxu1 %v1387_v34 }
 0x494   : > { %1599 = vmatpush3.msra.mxu0 %v1270_v53  ;;  %1636 = vmatprep.subr.mxu1 %v2078_v58 }
 0x495   : > { %1600 = vmatprep.subr.mxu0 %v1285_v52  ;;  %1637 = vmatpush3.msra.mxu1 %v1386_v35 }
 0x496   : > { %1226 = vperm.xlu1 %1777, %v1204_v33   ;;  %1601 = vmatpush3.msra.mxu0 %v1269_v39 }
 0x497   : > { %1602 = vmatprep.subr.mxu0 %v1284_v2  ;;  %1638 = vmatprep.subr.mxu1 %v2078_v58 }
 0x498   : > { %1603 = vmatpush3.msra.mxu0 %v1268_v17  ;;  %1639 = vmatpush3.msra.mxu1 %v1385_v16 }
 0x499   : > { %1604 = vmatprep.subr.mxu0 %v1283_v18  ;;  %1640 = vmatprep.subr.mxu1 %v2078_v58 }
 0x49a   : > { %1231 = vperm.xlu1 %1777, %v1205_v43   ;;  %1605 = vmatpush3.msra.mxu0 %v1267_v40  ;;  %v1383_v40 = vld [vmem:[#allocation13 + $0x50] sm:$0xff] }
 0x49b   : > { %1606 = vmatprep.subr.mxu0 %v1282_v20  ;;  %1641 = vmatpush3.msra.mxu1 %v1384_v24  ;;  %v1376_v20 = vld [vmem:[#allocation13 + $0x18] sm:$0xff] }
 0x49c   : > { %1607 = vmatpush3.msra.mxu0 %v1266_v21  ;;  %1642 = vmatprep.subr.mxu1 %v2078_v58  ;;  %v1375_v21 = vld [vmem:[#allocation13 + $0x10] sm:$0xff] }
 0x49d   : > { %1608 = vmatprep.subr.mxu0 %v1281_v23  ;;  %1643 = vmatpush3.msra.mxu1 %v1383_v40  ;;  %v1374_v23 = vld [vmem:[#allocation13 + $0x8] sm:$0xff] }
 0x49e   : > { %1236 = vperm.xlu1 %1777, %v1206_v59   ;;  %1609 = vmatpush3.msra.mxu0 %v1265_v48  ;;  %v1373_v48 = vld [vmem:[#allocation13] sm:$0xff] }
 0x49f   : > { %1610 = vmatprep.subr.mxu0 %v1280_v15  ;;  %1644 = vmatprep.subr.mxu1 %v2078_v58 }
 0x4a0   : > { %1611 = vmatpush3.msra.mxu0 %v1264_v27  ;;  %1664 = vmatprep.mubr.msk.f32.mxu1 %vm2079_vm15, %v2078_v58 }
 0x4a2   : > { %1241 = vperm.xlu1 %1777, %v1207_v19   ;;  %v1377_v19 = vld [vmem:[#allocation13 + $0x20] sm:$0xff] }
 0x4a6   : > { %1246 = vperm.xlu1 %1777, %v1208_v25  }
 0x509   : > { %v1217_v36 = vpop.permute.xlu1 %1216  ;;  %v1212_v38 = vpop.permute.xlu0 %1211 }
 0x50a   : > { %v1250_v31 = vmul.f32 %v1217_v36, %v2363_v50  ;;  %v1249_v29 = vmul.f32 %v1212_v38, %v2352_v45 }
 0x50c   : > { %v1257_v41 = vadd.f32 %v1250_v31, %v1249_v29 }
 0x50d   : > { %v1222_v37 = vpop.permute.xlu1 %1221 }
 0x50e   : > { %v1251_v30 = vmul.f32 %v1222_v37, %v2350_v44 }
 0x510   : > { %v1258_v43 = vadd.f32 %v1257_v41, %v1251_v30 }
 0x511   : > { %v1227_v0 = vpop.permute.xlu1 %1226 }
 0x512   : > { %v1252_v42 = vmul.f32 %v1227_v0, %v2361_v49  ;;  %v1382_v49 = vld [vmem:[#allocation13 + $0x48] sm:$0xff] }
 0x513   : > { %1645 = vmatpush3.msra.mxu1 %v1382_v49 }
 0x514   : > { %v1259_v53 = vadd.f32 %v1258_v43, %v1252_v42  ;;  %1646 = vmatprep.subr.mxu1 %v2078_v58  ;;  %v1491_v43 = vstv %s2060_s5  ;;  %s782_s5 = sadd.s32 1, %s2060_s5  }
 0x515   : > { %v1232_v33 = vpop.permute.xlu1 %1231  ;;  %vm1492_vm3 = vcmp.eq.s32.totalorder %v2278_v55, %v1491_v43  ;;  %p779_p3 = scmp.ge.s32.totalorder %s782_s5, 8  }
 0x516   : > { %v1253_v46 = vmul.f32 %v1232_v33, %v2371_v57  ;;  %v1380_v57 = vld [vmem:[#allocation13 + $0x38] sm:$0xff]  ;;  %vm1495_vm4 = vcmask (%p779_p3), 64512   ;;  %s2080_s23 = smov (%p779_p3), [#allocation15]   ;;  %s2081_s27 = smov (%p779_p3), [#allocation16]  }
 0x517   :  { %s1504_s26 = sshll.u32 (%p779_p3), %s2080_s23, 4  ;;  %s1514_s28 = sshll.u32 (%p779_p3), %s2081_s27, 4  ;;  %s1505_s26 = int_to_ptr.vmem [resolvable:$true] %s1504_s26  ;;  %s1515_s28 = int_to_ptr.vmem [resolvable:$true] %s1514_s28 }
 0x518   : > { %v1260_v59 = vadd.f32 %v1259_v53, %v1253_v46  ;;  %s1938_s0 = scalar_lea.vmem (%p779_p3), %s1505_s26, 128  ;;  %p1943_p5 = scmp.lt.s32.totalorder (%p779_p3), %s1505_s26, %s1505_s26 }
 0x519   : > { %v1237_v32 = vpop.permute.xlu1 %1236  ;;  %p1939_p4 = scmp.ne.s32.totalorder (%p779_p3), %s1505_s26, %s1938_s0  ;;  %p1944_p6 = scmp.lt.s32.totalorder (%p779_p3), %s1938_s0, %s1938_s0 }
 0x51a   : > { %v1254_v52 = vmul.f32 %v1237_v32, %v2369_v56  ;;  %v1381_v56 = vld [vmem:[#allocation13 + $0x40] sm:$0xff] }
 0x51b   : > { %1647 = vmatpush3.msra.mxu1 %v1381_v56  ;;  %p1945_p7 = por (%p779_p3), %p1944_p6, %p1943_p5 }
 0x51c   : > { %v1261_v50 = vadd.f32 %v1260_v59, %v1254_v52  ;;  %1648 = vmatprep.subr.mxu1 %v2078_v58 }
 0x51d   : > { %v1242_v39 = vpop.permute.xlu1 %1241  ;;  %1649 = vmatpush3.msra.mxu1 %v1380_v57  ;;  %p1946_p8 = pnand (%p779_p3), %p1945_p7, %p1939_p4 }
 0x51e   : > { %v1255_v2 = vmul.f32 %v1242_v39, %v2379_v61  ;;  %v1379_v61 = vld [vmem:[#allocation13 + $0x30] sm:$0xff]  ;;  %1650 = vmatprep.subr.mxu1 %v2078_v58 }
 0x51f   : > { %1651 = vmatpush3.msra.mxu1 %v1379_v61 }
 0x520   : > { %v1262_v45 = vadd.f32 %v1261_v50, %v1255_v2  ;;  %1652 = vmatprep.subr.mxu1 %v2078_v58 }
 0x521   : > { %v1247_v17 = vpop.permute.xlu1 %1246 }
 0x522   : > { %v1256_v18 = vmul.f32 %v1247_v17, %v2377_v60  ;;  %v1378_v60 = vld [vmem:[#allocation13 + $0x28] sm:$0xff] }
 0x523   : > { %1653 = vmatpush3.msra.mxu1 %v1378_v60 }
 0x524   : > { %v1263_v44 = vadd.f32 %v1262_v45, %v1256_v18  ;;  %1654 = vmatprep.subr.mxu1 %v2078_v58 }
 0x525   : > { %1655 = vmatpush3.msra.mxu1 %v1377_v19 }
 0x526   : > { %1367 = vmatmul.mubr.f32.vlgmr.msra.gmra.mxu0 %v1263_v44  ;;  %1656 = vmatprep.subr.mxu1 %v2078_v58 }
 0x527   : > { %1657 = vmatpush3.msra.mxu1 %v1376_v20 }
 0x528   : > { %1658 = vmatprep.subr.mxu1 %v2078_v58 }
 0x529   : > { %1659 = vmatpush3.msra.mxu1 %v1375_v21 }
 0x52a   : > { %1660 = vmatprep.subr.mxu1 %v2078_v58 }
 0x52b   : > { %1661 = vmatpush3.msra.mxu1 %v1374_v23 }
 0x52c   : > { %1662 = vmatprep.subr.mxu1 %v2078_v58 }
 0x52d   : > { %1663 = vmatpush3.msra.mxu1 %v1373_v48 }
 0x5e6   : > { %v1612_v25 = vpop.f32.mrf.mxu0 }
 0x5e8   : > { %v1613_v15 = vpop.f32.mrf.mxu0 }
 0x5e9   : > { %v1614_v27 = vadd.f32 %v1613_v15, %v1612_v25 }
 0x5eb   : > { %v1369_v28 = vadd.f32 %v1614_v27, %v2203_v4 }
 0x5ed   : > { %1812 = vtanh.f32 %v1369_v28 }
 0x5fa   : > { %v1813_v34 = vpop.eup %1812 }
 0x5fb   : > { %1665 = vmatmul.mubr.f32.vlgmr.msra.gmra.mxu1 %v1813_v34 }
 0x6bb   : > { %v1461_v35 = vpop.f32.mrf.mxu1 }
 0x6bc   : > { %v1462_v16 = vadd.f32 %v2208_v5, %v1461_v35 }
 0x6bd   : > { %v1666_v24 = vpop.f32.mrf.mxu1 }
 0x6be   : > { %1465 = vmax.xlane.f32.xlu1 %v1462_v16 }
 0x747   : > { %v1466_v36 = vpop.xlane.xlu1 %1465 }
 0x748   : > { %v1467_v37 = vsub.f32 %v1462_v16, %v1466_v36  ;;  %vm1475_vm0 = vcmp.eq.f32.partialorder %v1462_v16, %v1466_v36 }
 0x749   : > { %v1476_v38 = vsel %vm1475_vm0, %v2278_v55, 128 }
 0x74a   : > { %v1468_v58 = vmul.f32 1.442695, %v1467_v37  ;;  %v1478_v0 = vshra.s32 %v1476_v38, 16  ;;  %v1477_v33 = vand.u32 65535, %v1476_v38 }
 0x74c   : > { %1814 = vpow2.f32 %v1468_v58  ;;  %v1480_v31 = vcvt.s32.f32 %v1478_v0  ;;  %v1479_v41 = vcvt.s32.f32 %v1477_v33 }
 0x74e   : > { %1481 = vmin.xlane.f32.xlu0 %v1480_v31 }
 0x759   : > { %v1815_v29 = vpop.eup %1814 }
 0x75a   : > { %1470 = vadd.xlane.f32.xlu0 %v1815_v29 }
 0x7d7   : > { %v1482_v30 = vpop.xlane.xlu0 %1481 }
 0x7d8   : > { %vm1483_vm1 = vcmp.eq.f32.partialorder %v1480_v31, %v1482_v30  ;;  %v1488_v59 = vcvt.f32.s32 %v1482_v30 }
 0x7d9   : > { %v1484_v42 = vsel %vm1483_vm1, %v1479_v41, inf }
 0x7da   : > { %1485 = vmin.xlane.f32.xlu1 %v1484_v42  ;;  %v1489_v50 = vshll.u32 %v1488_v59, 16 }
 0x7e3   : > { %v1471_v32 = vpop.xlane.xlu0 %1470 }
 0x7e4   : > { %1816 = vlog2.f32 %v1471_v32 }
 0x7f1   : > { %v1817_v46 = vpop.eup %1816 }
 0x7f2   : > { %v1473_v53 = vmul.f32 0.6931472, %v1817_v46 }
 0x7f4   : > { %v1474_v52 = vsub.f32 0.0, %v1473_v53 }
 0x7f6   : > { %v1494_v39 = vsel %vm1492_vm3, %v1474_v52, %v2040_v13  }
 0x7f7   : > { %v2495_v13 = vmov %v1494_v39  ;;  %1497 = vst.msk [vmem:[#allocation16] sm:$0xff] (%p779_p3), %vm1495_vm4, %v1494_v39 }
 0x863   : > { %v1486_v2 = vpop.xlane.xlu1 %1485 }
 0x864   : > { %v1487_v17 = vcvt.f32.s32 %v1486_v2 }
 0x865   :  { %781 = sbr.rel (!%p779_p3) target bundleno = 640 (0x280), region = 123 }
 0x866   : > { %v1490_v15 = vadd.s32 %v1489_v50, %v1487_v17  }
 0x868   : > { %v1493_v45 = vsel %vm1492_vm3, %v1490_v15, %v2044_v14  }
 0x869   : > { %v2496_v14 = vmov %v1493_v45  ;;  %1496 = vst.msk [vmem:[#allocation15] sm:$0xff] (%p779_p3), %vm1495_vm4, %v1493_v45 }
 0x86a   :  { %1949 = shalt.err (!%p1946_p8)
}
 0x86b   :  { %1507 = dma.vmem_to_hbm [thread:$0]  %s1505_s26, 128, %s2491_s11, [#allocation6]  }
 0x86c   :  { %s1958_s13 = scalar_lea.vmem %s1515_s28, 128  ;;  %p1963_p10 = scmp.lt.s32.totalorder %s1515_s28, %s1515_s28 }
 0x86d   :  { %p1959_p9 = scmp.ne.s32.totalorder %s1515_s28, %s1958_s13  ;;  %p1964_p11 = scmp.lt.s32.totalorder %s1958_s13, %s1958_s13 }
 0x86f   :  { %p1965_p12 = por %p1964_p11, %p1963_p10 }
 0x871   :  { %p1966_p13 = pnand %p1965_p12, %p1959_p9 }
 0x873   :  { %1969 = shalt.err (!%p1966_p13)
}
 0x874   :  { %1517 = dma.vmem_to_hbm [thread:$0]  %s1515_s28, 128, %s2492_s12, [#allocation17]  }
 0x875   :  { %2022 = dma.done.wait [#allocation6], 128  }
 0x876   :  { %2023 = vsyncadd [#allocation6], 4294967168 }
 0x877   :  { %2024 = dma.done.wait [#allocation17], 128  }
 0x878   :  { %2025 = vsyncadd [#allocation17], 4294967168 }
 0x879   :  { %1524 = vsyncpa [#allocation5], 1 }
 0x87a   :  { %1525 = vsyncpa [#allocation8], 1 }
 0x87b   :  { %1526 = vsyncpa [#allocation11], 1 }
 0x87c   :  { %1527 = vsyncpa [#allocation14], 1 }
 0x87d   :  { %1528 = vsyncpa [#allocation6], 1 }
 0x87e   :  { %1529 = vsyncpa [#allocation17], 1 }

</bundles_post_ra>
